<compile_context>
chip_gen: v6e
topology: v6e:2x2x1
jax: 0.10.0
libtpu: 0.0.40
codegen_flags: <defaults>
</compile_context>

<pallas_src>
import functools
import math

import jax
import jax.numpy as jnp
from jax.experimental import pallas as pl
from jax.experimental.pallas import tpu as pltpu


_NEG = -1e30          # large-but-finite additive mask (avoids inf/NaN in softmax)


def _round_up(x, m):
    return ((x + m - 1) // m) * m


def _tpu_vmem_capacity():
    try:
        return int(pltpu.get_tpu_info().vmem_capacity_bytes)
    except Exception:
        return 64 * 1024 * 1024


_VMEM_CAP = _tpu_vmem_capacity()
_VMEM_LIMIT = min(int(_VMEM_CAP * 3 // 4), 96 * 1024 * 1024)
_MAX_TM = 1024 if _VMEM_CAP >= 100 * 1024 * 1024 else 512   # v5e/v6e vs v7x


def _pick_rows(M, max_tm):
    """Balanced row tiling: tm (mult of 8), padded M.  Avoids pathological pad."""
    n = -(-M // max_tm)                      # number of row tiles
    tm = _round_up(-(-M // n), 8)
    return tm, tm * n


def _pick_cols(N):
    """Output-column tiling (lane-dense)."""
    if N <= 512:
        return N, N                          # single full-extent column tile
    Np = _round_up(N, 128)
    tn = next((c for c in (768, 512, 384, 256, 128) if Np % c == 0), Np)
    return Np, tn


# ----------------------------- Pallas kernels ------------------------------ #

def _fused_linear_kernel(x_ref, w_ref, b_ref, *rest,
                         has_ln, activation, has_residual, eps):
    """y = act((LN(x)|x) @ w + b) [+ residual]; bf16 MXU, f32 accumulate.

    LN prologue is computed once per row tile (at j == 0) and cached in a
    (tm, K) bf16 VMEM scratch so it is not redone for every column tile.
    """
    idx = 0
    if has_ln:
        g_ref, be_ref = rest[0], rest[1]
        idx = 2
    if has_residual:
        res_ref = rest[idx]
        idx += 1
    o_ref = rest[idx]
    idx += 1
    xn_ref = rest[idx] if has_ln else None

    if has_ln:
        @pl.when(pl.program_id(1) == 0)
        def _():
            x = x_ref[...].astype(jnp.float32)
            mu = jnp.mean(x, axis=-1, keepdims=True)
            var = jnp.mean(jnp.square(x - mu), axis=-1, keepdims=True)
            xn = (x - mu) * jax.lax.rsqrt(var + eps)
            xn_ref[...] = (xn * g_ref[...] + be_ref[...]).astype(jnp.bfloat16)
        xb = xn_ref[...]
    else:
        xb = x_ref[...].astype(jnp.bfloat16)

    y = jnp.dot(xb, w_ref[...], preferred_element_type=jnp.float32)
    y = y + b_ref[...].astype(jnp.float32)

    if activation == "gelu":            # exact (erf) GELU, as in HF ViLT
        y = 0.5 * y * (1.0 + jax.lax.erf(y * 0.7071067811865476))
    elif activation == "tanh":
        y = jnp.tanh(y)

    if has_residual:
        y = y + res_ref[...].astype(jnp.float32)

    o_ref[...] = y.astype(o_ref.dtype)


def fused_linear(x, w, b, *, ln=None, activation="none", residual=None,
                 out_dtype=jnp.bfloat16, eps=1e-12):
    """Tiled y = act((LN(x)|x) @ w + b) [+ residual].  x:[M,K] w:[K,N] b:[N]."""
    M, K = x.shape
    N = w.shape[1]
    Np, tn = _pick_cols(N)
    tm, Mp = _pick_rows(M, _MAX_TM)

    xx = x if Mp == M else jnp.pad(x, ((0, Mp - M), (0, 0)))
    ww = w.astype(jnp.bfloat16)
    bb = b.astype(jnp.float32).reshape(1, N)
    if Np != N:
        ww = jnp.pad(ww, ((0, 0), (0, Np - N)))
        bb = jnp.pad(bb, ((0, 0), (0, Np - N)))

    in_specs = [pl.BlockSpec((tm, K), lambda i, j: (i, 0)),
                pl.BlockSpec((K, tn), lambda i, j: (0, j)),
                pl.BlockSpec((1, tn), lambda i, j: (0, j))]
    operands = [xx, ww, bb]

    if ln is not None:
        g, be = ln
        in_specs += [pl.BlockSpec((1, K), lambda i, j: (0, 0)),
                     pl.BlockSpec((1, K), lambda i, j: (0, 0))]
        operands += [g.astype(jnp.float32).reshape(1, K),
                     be.astype(jnp.float32).reshape(1, K)]

    if residual is not None:
        rr = residual
        if Mp != M or Np != N:
            rr = jnp.pad(rr, ((0, Mp - M), (0, Np - N)))
        in_specs.append(pl.BlockSpec((tm, tn), lambda i, j: (i, j)))
        operands.append(rr)

    scratch_shapes = [pltpu.VMEM((tm, K), jnp.bfloat16)] if ln is not None else []

    out = pl.pallas_call(
        functools.partial(_fused_linear_kernel, has_ln=ln is not None,
                          activation=activation,
                          has_residual=residual is not None, eps=eps),
        out_shape=jax.ShapeDtypeStruct((Mp, Np), out_dtype),
        grid=(Mp // tm, Np // tn),
        in_specs=in_specs,
        out_specs=pl.BlockSpec((tm, tn), lambda i, j: (i, j)),
        scratch_shapes=scratch_shapes,
        compiler_params=pltpu.CompilerParams(
            dimension_semantics=("parallel", "arbitrary"),
            vmem_limit_bytes=_VMEM_LIMIT),
    )(*operands)

    if Mp != M or Np != N:
        out = out[:M, :N]
    return out


def _mlp_kernel(x_ref, wi_ref, bi_ref, wo_ref, bo_ref, g_ref, be_ref, o_ref,
                xn_ref, acc_ref, *, eps):
    """Fused ViT MLP block: out = x + (GELU(LN(x) @ wi + bi)) @ wo + bo.

    Grid axis 1 tiles the intermediate dimension; the [tm, I] intermediate
    never leaves VMEM.  LN(x) is cached once per row tile.
    """
    j = pl.program_id(1)

    @pl.when(j == 0)
    def _():
        x = x_ref[...].astype(jnp.float32)
        mu = jnp.mean(x, axis=-1, keepdims=True)
        var = jnp.mean(jnp.square(x - mu), axis=-1, keepdims=True)
        xn = (x - mu) * jax.lax.rsqrt(var + eps)
        xn_ref[...] = (xn * g_ref[...] + be_ref[...]).astype(jnp.bfloat16)
        acc_ref[...] = jnp.zeros_like(acc_ref)

    h = jnp.dot(xn_ref[...], wi_ref[...], preferred_element_type=jnp.float32)
    h = h + bi_ref[...].astype(jnp.float32)
    h = 0.5 * h * (1.0 + jax.lax.erf(h * 0.7071067811865476))     # exact GELU
    acc_ref[...] += jnp.dot(h.astype(jnp.bfloat16), wo_ref[...],
                            preferred_element_type=jnp.float32)

    @pl.when(j == pl.num_programs(1) - 1)
    def _():
        y = acc_ref[...] + bo_ref[...].astype(jnp.float32) \
            + x_ref[...].astype(jnp.float32)                      # residual
        o_ref[...] = y.astype(o_ref.dtype)


def mlp_block(x, g, be, wi, bi, wo2, bo2, eps):
    """x:[M,D] -> x + GELU(LN(x) @ wi + bi) @ wo2 + bo2, one kernel."""
    M, D = x.shape
    I = wi.shape[1]
    tm, Mp = _pick_rows(M, _MAX_TM)
    if I <= 512:
        ti = I
    else:
        ti = next((c for c in (512, 384, 256, 128) if I % c == 0), I)

    xx = x if Mp == M else jnp.pad(x, ((0, Mp - M), (0, 0)))

    out = pl.pallas_call(
        functools.partial(_mlp_kernel, eps=eps),
        out_shape=jax.ShapeDtypeStruct((Mp, D), x.dtype),
        grid=(Mp // tm, I // ti),
        in_specs=[pl.BlockSpec((tm, D), lambda i, j: (i, 0)),
                  pl.BlockSpec((D, ti), lambda i, j: (0, j)),
                  pl.BlockSpec((1, ti), lambda i, j: (0, j)),
                  pl.BlockSpec((ti, D), lambda i, j: (j, 0)),
                  pl.BlockSpec((1, D), lambda i, j: (0, 0)),
                  pl.BlockSpec((1, D), lambda i, j: (0, 0)),
                  pl.BlockSpec((1, D), lambda i, j: (0, 0))],
        out_specs=pl.BlockSpec((tm, D), lambda i, j: (i, 0)),
        scratch_shapes=[pltpu.VMEM((tm, D), jnp.bfloat16),
                        pltpu.VMEM((tm, D), jnp.float32)],
        compiler_params=pltpu.CompilerParams(
            dimension_semantics=("parallel", "arbitrary"),
            vmem_limit_bytes=_VMEM_LIMIT),
    )(xx, wi.astype(jnp.bfloat16), bi.astype(jnp.float32).reshape(1, I),
      wo2.astype(jnp.bfloat16), bo2.astype(jnp.float32).reshape(1, D),
      g.astype(jnp.float32).reshape(1, D), be.astype(jnp.float32).reshape(1, D))
    return out[:M] if Mp != M else out


def _layernorm_kernel(x_ref, g_ref, b_ref, o_ref, *, eps):
    x = x_ref[...].astype(jnp.float32)
    mu = jnp.mean(x, axis=-1, keepdims=True)
    var = jnp.mean(jnp.square(x - mu), axis=-1, keepdims=True)
    y = (x - mu) * jax.lax.rsqrt(var + eps)
    o_ref[...] = (y * g_ref[...] + b_ref[...]).astype(o_ref.dtype)


def layernorm(x, g, b, eps, out_dtype=jnp.float32):
    """Row-tiled LayerNorm over last dim.  x:[M,D], g/b:[D]."""
    M, D = x.shape
    tm, Mp = _pick_rows(M, 512)
    xx = x if Mp == M else jnp.pad(x, ((0, Mp - M), (0, 0)))
    out = pl.pallas_call(
        functools.partial(_layernorm_kernel, eps=eps),
        out_shape=jax.ShapeDtypeStruct((Mp, D), out_dtype),
        grid=(Mp // tm,),
        in_specs=[pl.BlockSpec((tm, D), lambda i: (i, 0)),
                  pl.BlockSpec((1, D), lambda i: (0, 0)),
                  pl.BlockSpec((1, D), lambda i: (0, 0))],
        out_specs=pl.BlockSpec((tm, D), lambda i: (i, 0)),
        compiler_params=pltpu.CompilerParams(
            dimension_semantics=("parallel",)),
    )(xx, g.reshape(1, D), b.reshape(1, D))
    return out[:M] if Mp != M else out


def _attn_kernel(qkv_ref, b_ref, o_ref, *, num_heads, head_dim, hidden):
    """All-heads single-pass softmax attention for one batch element.

    qkv_ref: (1, Lp, 3D) bf16, q pre-scaled by 1/sqrt(hd).
    b_ref:   (1, 1, Lp)  f32 additive key mask.
    o_ref:   (1, Lp, D)  bf16 context, written lane-dense once per step.
    """
    bias = b_ref[0].astype(jnp.float32)                      # (1, Lp)
    heads = []
    for h in range(num_heads):                               # unrolled
        lo = h * head_dim
        q = qkv_ref[0, :, lo:lo + head_dim]                  # (Lp, hd)
        k = qkv_ref[0, :, hidden + lo:hidden + lo + head_dim]
        v = qkv_ref[0, :, 2 * hidden + lo:2 * hidden + lo + head_dim]
        s = jax.lax.dot_general(q, k, (((1,), (1,)), ((), ())),
                                preferred_element_type=jnp.float32)   # (Lp, Lp)
        s = s + bias
        m = jnp.max(s, axis=-1, keepdims=True)
        p = jnp.exp(s - m)
        l = jnp.sum(p, axis=-1, keepdims=True)
        ctx = jnp.dot(p.astype(jnp.bfloat16), v, preferred_element_type=jnp.float32)
        heads.append(ctx * pl.reciprocal(l, approx=True))
    o_ref[0] = jnp.concatenate(heads, axis=-1).astype(o_ref.dtype)


def attention(qkv3, bias3, num_heads, head_dim, hidden):
    """qkv3:[B,Lp,3D] bf16 (q pre-scaled), bias3:[B,1,Lp] f32 -> ctx:[B,Lp,D]."""
    B, Lp, threeD = qkv3.shape
    return pl.pallas_call(
        functools.partial(_attn_kernel, num_heads=num_heads,
                          head_dim=head_dim, hidden=hidden),
        out_shape=jax.ShapeDtypeStruct((B, Lp, hidden), jnp.bfloat16),
        grid=(B,),
        in_specs=[pl.BlockSpec((1, Lp, threeD), lambda b: (b, 0, 0)),
                  pl.BlockSpec((1, 1, Lp), lambda b: (b, 0, 0))],
        out_specs=pl.BlockSpec((1, Lp, hidden), lambda b: (b, 0, 0)),
        compiler_params=pltpu.CompilerParams(
            dimension_semantics=("parallel",),
            vmem_limit_bytes=_VMEM_LIMIT),
    )(qkv3, bias3)


def _head_kernel(h_ref, g_ref, be_ref, pw_ref, pb_ref, fw_ref, fb_ref, o_ref, *, eps):
    """Final LN (on CLS rows) + pooler dense + tanh + classifier, fused."""
    x = h_ref[...].astype(jnp.float32)
    mu = jnp.mean(x, axis=-1, keepdims=True)
    var = jnp.mean(jnp.square(x - mu), axis=-1, keepdims=True)
    x = (x - mu) * jax.lax.rsqrt(var + eps) * g_ref[...] + be_ref[...]
    pooled = jnp.tanh(jnp.dot(x.astype(jnp.bfloat16), pw_ref[...],
                              preferred_element_type=jnp.float32) + pb_ref[...])
    logits = jnp.dot(pooled.astype(jnp.bfloat16), fw_ref[...],
                     preferred_element_type=jnp.float32) + fb_ref[...]
    o_ref[...] = logits


def pooler_classifier(cls_h, g, be, pw, pb, fw, fb, eps):
    B, D = cls_h.shape
    n_out = fw.shape[1]
    Np = max(128, _round_up(n_out, 128))          # lane-dense classifier output
    fw_p = jnp.pad(fw.astype(jnp.bfloat16), ((0, 0), (0, Np - n_out)))
    fb_p = jnp.pad(fb.astype(jnp.float32), (0, Np - n_out)).reshape(1, Np)
    out = pl.pallas_call(
        functools.partial(_head_kernel, eps=eps),
        out_shape=jax.ShapeDtypeStruct((B, Np), jnp.float32),
        grid=(1,),
        in_specs=[pl.BlockSpec((B, D), lambda i: (0, 0)),
                  pl.BlockSpec((1, D), lambda i: (0, 0)),
                  pl.BlockSpec((1, D), lambda i: (0, 0)),
                  pl.BlockSpec((D, D), lambda i: (0, 0)),
                  pl.BlockSpec((1, D), lambda i: (0, 0)),
                  pl.BlockSpec((D, Np), lambda i: (0, 0)),
                  pl.BlockSpec((1, Np), lambda i: (0, 0))],
        out_specs=pl.BlockSpec((B, Np), lambda i: (0, 0)),
        compiler_params=pltpu.CompilerParams(vmem_limit_bytes=_VMEM_LIMIT),
    )(cls_h, g.reshape(1, D), be.reshape(1, D), pw.astype(jnp.bfloat16),
      pb.astype(jnp.float32).reshape(1, D), fw_p, fb_p)
    return out[:, :n_out]


# ------------------------------ model wrapper ------------------------------ #

def init_params(key, cfg, n_sentiment):
    D = cfg["hidden_size"]
    I = cfg["intermediate_size"]
    C, ps = cfg["num_channels"], cfg["patch_size"]
    P = (cfg["image_size"] // ps) ** 2
    keys = iter(jax.random.split(key, 64))

    def nrm(shape, s=0.02):
        return jax.random.normal(next(keys), shape, jnp.float32) * s

    params = dict(
        word_emb=nrm((cfg["vocab_size"], D)),
        text_pos_emb=nrm((cfg["max_position_embeddings"], D)),
        text_type_emb=nrm((cfg["type_vocab_size"], D)),
        text_ln_g=jnp.ones((D,), jnp.float32),
        text_ln_b=jnp.zeros((D,), jnp.float32),
        patch_w=nrm((C * ps * ps, D)),           # == torch conv weight [D,C,ps,ps].T
        patch_b=jnp.zeros((D,), jnp.float32),
        cls_token=nrm((1, D)),
        img_pos_emb=nrm((P + 1, D)),
        modality_emb=nrm((cfg["modality_type_vocab_size"], D)),
        final_ln_g=jnp.ones((D,), jnp.float32),
        final_ln_b=jnp.zeros((D,), jnp.float32),
        pool_w=nrm((D, D)),
        pool_b=jnp.zeros((D,), jnp.float32),
        fc_w=nrm((D, n_sentiment)),
        fc_b=jnp.zeros((n_sentiment,), jnp.float32),
        layers=[],
    )
    for _ in range(cfg["num_layers"]):
        params["layers"].append(dict(
            ln1_g=jnp.ones((D,), jnp.float32), ln1_b=jnp.zeros((D,), jnp.float32),
            wq=nrm((D, D)), bq=jnp.zeros((D,), jnp.float32),
            wk=nrm((D, D)), bk=jnp.zeros((D,), jnp.float32),
            wv=nrm((D, D)), bv=jnp.zeros((D,), jnp.float32),
            wo=nrm((D, D)), bo=jnp.zeros((D,), jnp.float32),
            ln2_g=jnp.ones((D,), jnp.float32), ln2_b=jnp.zeros((D,), jnp.float32),
            wi=nrm((D, I)), bi=jnp.zeros((I,), jnp.float32),
            wo2=nrm((I, D)), bo2=jnp.zeros((D,), jnp.float32),
        ))
    return params


def prepare_params(params, cfg):
    """One-time weight prep: fuse QKV (fold 1/sqrt(hd) into q), pre-cast to bf16."""
    D = cfg["hidden_size"]
    scale = 1.0 / math.sqrt(D // cfg["num_heads"])
    prepared = dict(params)
    prepared["patch_w"] = params["patch_w"].astype(jnp.bfloat16)
    prepared["pool_w"] = params["pool_w"].astype(jnp.bfloat16)
    layers = []
    for lp in params["layers"]:
        nl = dict(lp)
        nl["wqkv"] = jnp.concatenate(
            [lp["wq"] * scale, lp["wk"], lp["wv"]], axis=1).astype(jnp.bfloat16)
        nl["bqkv"] = jnp.concatenate(
            [lp["bq"] * scale, lp["bk"], lp["bv"]], axis=0).astype(jnp.float32)
        nl["wo"] = lp["wo"].astype(jnp.bfloat16)
        nl["wi"] = lp["wi"].astype(jnp.bfloat16)
        nl["wo2"] = lp["wo2"].astype(jnp.bfloat16)
        for k in ("wq", "wk", "wv", "bq", "bk", "bv"):
            nl.pop(k)
        layers.append(nl)
    prepared["layers"] = layers
    return prepared


def vilt_meme_sentiment_forward(params, input_ids, token_type_ids,
                                attention_mask, pixel_values, cfg):
    B, Lt = input_ids.shape
    D = cfg["hidden_size"]
    H = cfg["num_heads"]
    hd = D // H
    ps, C = cfg["patch_size"], cfg["num_channels"]
    eps = cfg["layer_norm_eps"]

    # ---- text embeddings (ViltTextEmbeddings) ----
    we = params["word_emb"][input_ids]                       # gather (XLA glue)
    pe = params["text_pos_emb"][:Lt][None, :, :]
    te = params["text_type_emb"][token_type_ids]
    text = layernorm((we + pe + te).reshape(B * Lt, D),
                     params["text_ln_g"], params["text_ln_b"], eps).reshape(B, Lt, D)

    # ---- visual embeddings (ViltPatchEmbeddings conv as tiled Pallas matmul) ----
    gh = gw = cfg["image_size"] // ps
    P = gh * gw
    x = pixel_values.reshape(B, C, gh, ps, gw, ps)
    x = x.transpose(0, 2, 4, 1, 3, 5).reshape(B * P, C * ps * ps)
    patches = fused_linear(x, params["patch_w"], params["patch_b"],
                           out_dtype=jnp.float32).reshape(B, P, D)
    cls = jnp.broadcast_to(params["cls_token"][None], (B, 1, D))
    img = jnp.concatenate([cls, patches], axis=1) + params["img_pos_emb"][None]
    # TODO(synk): HF bilinearly interpolates patch position embeddings for
    # non-default image sizes; identity here since image_size == config.image_size.

    # ---- modality-type embeddings, concat, pad sequence ONCE, cast to bf16 ----
    text = text + params["modality_emb"][0][None, None, :]
    img = img + params["modality_emb"][1][None, None, :]
    h = jnp.concatenate([text, img], axis=1)                 # [B, L, D]
    L = h.shape[1]
    Lp = _round_up(L, 16)                                    # bf16 sublane granularity
    if Lp != L:
        h = jnp.pad(h, ((0, 0), (0, Lp - L), (0, 0)))
    M = B * Lp
    h2d = h.reshape(M, D).astype(jnp.bfloat16)

    mask = jnp.concatenate([attention_mask.astype(jnp.float32),
                            jnp.ones((B, P + 1), jnp.float32)], axis=1)
    if Lp != L:
        mask = jnp.pad(mask, ((0, 0), (0, Lp - L)))          # padded keys masked out
    bias3 = ((1.0 - mask) * _NEG).reshape(B, 1, Lp)          # additive key mask

    # ---- ViT encoder layers ----
    for lp in params["layers"]:
        # fused LN1 + QKV projection (scale already folded into q weights)
        qkv = fused_linear(h2d, lp["wqkv"], lp["bqkv"],
                           ln=(lp["ln1_g"], lp["ln1_b"]), eps=eps)     # [M, 3D] bf16
        # attention consumes the fused QKV activation directly (no XLA
        # head-split/merge transposes); ctx comes back as [B, Lp, D].
        ctx = attention(qkv.reshape(B, Lp, 3 * D), bias3, H, hd, D)
        # attention output projection with fused residual add
        h2d = fused_linear(ctx.reshape(M, D), lp["wo"], lp["bo"],
                           residual=h2d, eps=eps)
        # fused MLP block (LN2 + up + GELU + down + residual) in one kernel
        h2d = mlp_block(h2d, lp["ln2_g"], lp["ln2_b"],
                        lp["wi"], lp["bi"], lp["wo2"], lp["bo2"], eps)

    # ---- final LN (CLS rows only) + pooler (tanh) + classifier, one kernel ----
    # Only pooler_output feeds the classifier, so LayerNorm is applied just to
    # the CLS token rows (identical to LN over the full sequence then token 0).
    cls_h = h2d.reshape(B, Lp, D)[:, 0, :]
    logits = pooler_classifier(cls_h, params["final_ln_g"], params["final_ln_b"],
                               params["pool_w"], params["pool_b"],
                               params["fc_w"], params["fc_b"], eps)
    return logits


# ---------------------------------- main ----------------------------------- #

if __name__ == "__main__":
    # Small synthetic ViltConfig (same structure, reduced dims)
    cfg = dict(hidden_size=128, num_layers=2, num_heads=4, intermediate_size=256,
               vocab_size=100, max_position_embeddings=40, type_vocab_size=2,
               modality_type_vocab_size=2, image_size=32, patch_size=16,
               num_channels=3, layer_norm_eps=1e-12)
    n_sentiment = 3

    key = jax.random.PRNGKey(0)
    pk, ik, xk = jax.random.split(key, 3)
    params = prepare_params(init_params(pk, cfg, n_sentiment), cfg)

    B, Lt = 2, 8
    input_ids = jax.random.randint(ik, (B, Lt), 0, cfg["vocab_size"], dtype=jnp.int32)
    token_type_ids = jnp.zeros((B, Lt), jnp.int32)
    attention_mask = jnp.ones((B, Lt), jnp.float32)
    pixel_values = jax.random.normal(xk, (B, cfg["num_channels"],
                                          cfg["image_size"], cfg["image_size"]),
                                     jnp.float32)

    fwd = jax.jit(functools.partial(vilt_meme_sentiment_forward, cfg=cfg))
    logits = fwd(params, input_ids, token_type_ids, attention_mask, pixel_values)
    jax.block_until_ready(logits)
    assert logits.shape == (B, n_sentiment) and logits.dtype == jnp.float32
    print("KERNEL_OK")
</pallas_src>

<mosaic_0001>
module attributes {stable_mosaic.version = 11 : i64} {
  func.func @_fused_linear_kernel(%arg0: i32, %arg1: i32, %arg2: memref<8x768xf32, #tpu.memory_space<vmem>>, %arg3: memref<768x128xbf16, #tpu.memory_space<vmem>>, %arg4: memref<1x128xf32, #tpu.memory_space<vmem>>, %arg5: memref<8x128xf32, #tpu.memory_space<vmem>>) attributes {dimension_semantics = [#tpu.dimension_semantics<parallel>, #tpu.dimension_semantics<arbitrary>], iteration_bounds = array<i64: 1, 1>, scalar_prefetch = 0 : i64, scratch_operands = 0 : i64, tpu.core_type = #tpu.core_type<tc>, window_params = [{transform_indices = @transform_0, window_bounds = array<i64: 8, 768>}, {transform_indices = @transform_1, window_bounds = array<i64: 768, 128>}, {transform_indices = @transform_2, window_bounds = array<i64: 1, 128>}, {transform_indices = @transform_3, window_bounds = array<i64: 8, 128>}]} {
    %c0 = arith.constant 0 : index
    %c0_0 = arith.constant 0 : index
    %0 = vector.load %arg2[%c0, %c0_0] : memref<8x768xf32, #tpu.memory_space<vmem>>, vector<8x768xf32>
    %1 = arith.truncf %0 : vector<8x768xf32> to vector<8x768xbf16>
    %c0_1 = arith.constant 0 : index
    %c0_2 = arith.constant 0 : index
    %2 = vector.load %arg3[%c0_1, %c0_2] : memref<768x128xbf16, #tpu.memory_space<vmem>>, vector<768x128xbf16>
    %cst = arith.constant dense<0.000000e+00> : vector<8x128xf32>
    %3 = tpu.matmul %1, %2, %cst {dimension_numbers = #tpu.dot_dimension_numbers<[1], [0], [0], [1], [0, 0, 1, 1], [], []>} : vector<8x768xbf16>, vector<768x128xbf16>, vector<8x128xf32> -> vector<8x128xf32>
    %c0_3 = arith.constant 0 : index
    %c0_4 = arith.constant 0 : index
    %4 = vector.load %arg4[%c0_3, %c0_4] : memref<1x128xf32, #tpu.memory_space<vmem>>, vector<1x128xf32>
    %5 = vector.broadcast %4 : vector<1x128xf32> to vector<8x128xf32>
    %6 = arith.addf %3, %5 : vector<8x128xf32>
    %c0_5 = arith.constant 0 : index
    %c0_6 = arith.constant 0 : index
    %7 = vector.load %arg5[%c0_5, %c0_6] : memref<8x128xf32, #tpu.memory_space<vmem>>, vector<8x128xf32>
    tpu.vector_store %arg5[%c0_5, %c0_6], %6 {strides = array<i32>} : memref<8x128xf32, #tpu.memory_space<vmem>>, vector<8x128xf32>,
    return
  }
  func.func @transform_0(%arg0: i32, %arg1: i32) -> (i32, i32) {
    %c0_i32 = arith.constant 0 : i32
    %c0_i32_0 = arith.constant 0 : i32
    return %arg0, %c0_i32 : i32, i32
  }
  func.func @transform_1(%arg0: i32, %arg1: i32) -> (i32, i32) {
    %c0_i32 = arith.constant 0 : i32
    %c0_i32_0 = arith.constant 0 : i32
    return %c0_i32, %arg1 : i32, i32
  }
  func.func @transform_2(%arg0: i32, %arg1: i32) -> (i32, i32) {
    %c0_i32 = arith.constant 0 : i32
    %c0_i32_0 = arith.constant 0 : i32
    return %c0_i32, %arg1 : i32, i32
  }
  func.func @transform_3(%arg0: i32, %arg1: i32) -> (i32, i32) {
    %c0_i32 = arith.constant 0 : i32
    return %arg0, %arg1 : i32, i32
  }
}

module attributes {stable_mosaic.version = 11 : i64} {
  func.func @_layernorm_kernel(%arg0: i32, %arg1: memref<16x128xf32, #tpu.memory_space<vmem>>, %arg2: memref<1x128xf32, #tpu.memory_space<vmem>>, %arg3: memref<1x128xf32, #tpu.memory_space<vmem>>, %arg4: memref<16x128xf32, #tpu.memory_space<vmem>>) attributes {dimension_semantics = [#tpu.dimension_semantics<parallel>], iteration_bounds = array<i64: 1>, scalar_prefetch = 0 : i64, scratch_operands = 0 : i64, tpu.core_type = #tpu.core_type<tc>, window_params = [{transform_indices = @transform_0, window_bounds = array<i64: 16, 128>}, {pipeline_mode = #tpu.pipeline_mode<synchronous>, transform_indices = @transform_1, window_bounds = array<i64: 1, 128>}, {pipeline_mode = #tpu.pipeline_mode<synchronous>, transform_indices = @transform_2, window_bounds = array<i64: 1, 128>}, {transform_indices = @transform_3, window_bounds = array<i64: 16, 128>}]} {
    %c0 = arith.constant 0 : index
    %c0_0 = arith.constant 0 : index
    %0 = vector.load %arg1[%c0, %c0_0] : memref<16x128xf32, #tpu.memory_space<vmem>>, vector<16x128xf32>
    %cst = arith.constant dense<0.000000e+00> : vector<16xf32>
    %1 = vector.multi_reduction <add>, %0, %cst [1] : vector<16x128xf32> to vector<16xf32>
    %2 = vector.shape_cast %1 : vector<16xf32> to vector<16x1xf32>
    %cst_1 = arith.constant 1.280000e+02 : f32
    %3 = vector.broadcast %cst_1 : f32 to vector<16x1xf32>
    %4 = arith.divf %2, %3 : vector<16x1xf32>
    %5 = vector.broadcast %4 : vector<16x1xf32> to vector<16x128xf32>
    %6 = arith.subf %0, %5 : vector<16x128xf32>
    %7 = arith.mulf %6, %6 : vector<16x128xf32>
    %cst_2 = arith.constant dense<0.000000e+00> : vector<16xf32>
    %8 = vector.multi_reduction <add>, %7, %cst_2 [1] : vector<16x128xf32> to vector<16xf32>
    %9 = vector.shape_cast %8 : vector<16xf32> to vector<16x1xf32>
    %cst_3 = arith.constant 1.280000e+02 : f32
    %10 = vector.broadcast %cst_3 : f32 to vector<16x1xf32>
    %11 = arith.divf %9, %10 : vector<16x1xf32>
    %12 = vector.broadcast %4 : vector<16x1xf32> to vector<16x128xf32>
    %13 = arith.subf %0, %12 : vector<16x128xf32>
    %cst_4 = arith.constant 9.99999996E-13 : f32
    %14 = vector.broadcast %cst_4 : f32 to vector<16x1xf32>
    %15 = arith.addf %11, %14 : vector<16x1xf32>
    %16 = math.rsqrt %15 : vector<16x1xf32>
    %17 = vector.broadcast %16 : vector<16x1xf32> to vector<16x128xf32>
    %18 = arith.mulf %13, %17 : vector<16x128xf32>
    %c0_5 = arith.constant 0 : index
    %c0_6 = arith.constant 0 : index
    %19 = vector.load %arg2[%c0_5, %c0_6] : memref<1x128xf32, #tpu.memory_space<vmem>>, vector<1x128xf32>
    %20 = vector.broadcast %19 : vector<1x128xf32> to vector<16x128xf32>
    %21 = arith.mulf %18, %20 : vector<16x128xf32>
    %c0_7 = arith.constant 0 : index
    %c0_8 = arith.constant 0 : index
    %22 = vector.load %arg3[%c0_7, %c0_8] : memref<1x128xf32, #tpu.memory_space<vmem>>, vector<1x128xf32>
    %23 = vector.broadcast %22 : vector<1x128xf32> to vector<16x128xf32>
    %24 = arith.addf %21, %23 : vector<16x128xf32>
    %c0_9 = arith.constant 0 : index
    %c0_10 = arith.constant 0 : index
    %25 = vector.load %arg4[%c0_9, %c0_10] : memref<16x128xf32, #tpu.memory_space<vmem>>, vector<16x128xf32>
    tpu.vector_store %arg4[%c0_9, %c0_10], %24 {strides = array<i32>} : memref<16x128xf32, #tpu.memory_space<vmem>>, vector<16x128xf32>,
    return
  }
  func.func @transform_0(%arg0: i32) -> (i32, i32) {
    %c0_i32 = arith.constant 0 : i32
    %c0_i32_0 = arith.constant 0 : i32
    return %arg0, %c0_i32 : i32, i32
  }
  func.func @transform_1(%arg0: i32) -> (i32, i32) {
    %c0_i32 = arith.constant 0 : i32
    %c0_i32_0 = arith.constant 0 : i32
    %c0_i32_1 = arith.constant 0 : i32
    return %c0_i32, %c0_i32_0 : i32, i32
  }
  func.func @transform_2(%arg0: i32) -> (i32, i32) {
    %c0_i32 = arith.constant 0 : i32
    %c0_i32_0 = arith.constant 0 : i32
    %c0_i32_1 = arith.constant 0 : i32
    return %c0_i32, %c0_i32_0 : i32, i32
  }
  func.func @transform_3(%arg0: i32) -> (i32, i32) {
    %c0_i32 = arith.constant 0 : i32
    %c0_i32_0 = arith.constant 0 : i32
    return %arg0, %c0_i32 : i32, i32
  }
}

module attributes {stable_mosaic.version = 11 : i64} {
  func.func @_fused_linear_kernel(%arg0: i32, %arg1: i32, %arg2: memref<32x128xbf16, #tpu.memory_space<vmem>>, %arg3: memref<128x384xbf16, #tpu.memory_space<vmem>>, %arg4: memref<1x384xf32, #tpu.memory_space<vmem>>, %arg5: memref<1x128xf32, #tpu.memory_space<vmem>>, %arg6: memref<1x128xf32, #tpu.memory_space<vmem>>, %arg7: memref<32x384xbf16, #tpu.memory_space<vmem>>, %arg8: memref<32x128xbf16, #tpu.memory_space<vmem>>) attributes {dimension_semantics = [#tpu.dimension_semantics<parallel>, #tpu.dimension_semantics<arbitrary>], iteration_bounds = array<i64: 1, 1>, scalar_prefetch = 0 : i64, scratch_operands = 1 : i64, tpu.core_type = #tpu.core_type<tc>, window_params = [{transform_indices = @transform_0, window_bounds = array<i64: 32, 128>}, {transform_indices = @transform_1, window_bounds = array<i64: 128, 384>}, {transform_indices = @transform_2, window_bounds = array<i64: 1, 384>}, {pipeline_mode = #tpu.pipeline_mode<synchronous>, transform_indices = @transform_3, window_bounds = array<i64: 1, 128>}, {pipeline_mode = #tpu.pipeline_mode<synchronous>, transform_indices = @transform_4, window_bounds = array<i64: 1, 128>}, {transform_indices = @transform_5, window_bounds = array<i64: 32, 384>}]} {
    %c0_i32 = arith.constant 0 : i32
    %0 = arith.cmpi eq, %arg1, %c0_i32 : i32
    %1 = arith.extui %0 : i1 to i32
    %c0_i32_0 = arith.constant 0 : i32
    %2 = arith.cmpi ne, %1, %c0_i32_0 : i32
    scf.if %2 {
      %c0_8 = arith.constant 0 : index
      %c0_9 = arith.constant 0 : index
      %11 = vector.load %arg2[%c0_8, %c0_9] : memref<32x128xbf16, #tpu.memory_space<vmem>>, vector<32x128xbf16>
      %12 = arith.extf %11 : vector<32x128xbf16> to vector<32x128xf32>
      %cst_10 = arith.constant dense<0.000000e+00> : vector<32xf32>
      %13 = vector.multi_reduction <add>, %12, %cst_10 [1] : vector<32x128xf32> to vector<32xf32>
      %14 = vector.shape_cast %13 : vector<32xf32> to vector<32x1xf32>
      %cst_11 = arith.constant 1.280000e+02 : f32
      %15 = vector.broadcast %cst_11 : f32 to vector<32x1xf32>
      %16 = arith.divf %14, %15 : vector<32x1xf32>
      %17 = vector.broadcast %16 : vector<32x1xf32> to vector<32x128xf32>
      %18 = arith.subf %12, %17 : vector<32x128xf32>
      %19 = arith.mulf %18, %18 : vector<32x128xf32>
      %cst_12 = arith.constant dense<0.000000e+00> : vector<32xf32>
      %20 = vector.multi_reduction <add>, %19, %cst_12 [1] : vector<32x128xf32> to vector<32xf32>
      %21 = vector.shape_cast %20 : vector<32xf32> to vector<32x1xf32>
      %cst_13 = arith.constant 1.280000e+02 : f32
      %22 = vector.broadcast %cst_13 : f32 to vector<32x1xf32>
      %23 = arith.divf %21, %22 : vector<32x1xf32>
      %24 = vector.broadcast %16 : vector<32x1xf32> to vector<32x128xf32>
      %25 = arith.subf %12, %24 : vector<32x128xf32>
      %cst_14 = arith.constant 9.99999996E-13 : f32
      %26 = vector.broadcast %cst_14 : f32 to vector<32x1xf32>
      %27 = arith.addf %23, %26 : vector<32x1xf32>
      %28 = math.rsqrt %27 : vector<32x1xf32>
      %29 = vector.broadcast %28 : vector<32x1xf32> to vector<32x128xf32>
      %30 = arith.mulf %25, %29 : vector<32x128xf32>
      %c0_15 = arith.constant 0 : index
      %c0_16 = arith.constant 0 : index
      %31 = vector.load %arg5[%c0_15, %c0_16] : memref<1x128xf32, #tpu.memory_space<vmem>>, vector<1x128xf32>
      %32 = vector.broadcast %31 : vector<1x128xf32> to vector<32x128xf32>
      %33 = arith.mulf %30, %32 : vector<32x128xf32>
      %c0_17 = arith.constant 0 : index
      %c0_18 = arith.constant 0 : index
      %34 = vector.load %arg6[%c0_17, %c0_18] : memref<1x128xf32, #tpu.memory_space<vmem>>, vector<1x128xf32>
      %35 = vector.broadcast %34 : vector<1x128xf32> to vector<32x128xf32>
      %36 = arith.addf %33, %35 : vector<32x128xf32>
      %37 = arith.truncf %36 : vector<32x128xf32> to vector<32x128xbf16>
      %c0_19 = arith.constant 0 : index
      %c0_20 = arith.constant 0 : index
      %38 = vector.load %arg8[%c0_19, %c0_20] : memref<32x128xbf16, #tpu.memory_space<vmem>>, vector<32x128xbf16>
      tpu.vector_store %arg8[%c0_19, %c0_20], %37 {strides = array<i32>} : memref<32x128xbf16, #tpu.memory_space<vmem>>, vector<32x128xbf16>,
    } else {
    }
    %c0 = arith.constant 0 : index
    %c0_1 = arith.constant 0 : index
    %3 = vector.load %arg8[%c0, %c0_1] : memref<32x128xbf16, #tpu.memory_space<vmem>>, vector<32x128xbf16>
    %c0_2 = arith.constant 0 : index
    %c0_3 = arith.constant 0 : index
    %4 = vector.load %arg3[%c0_2, %c0_3] : memref<128x384xbf16, #tpu.memory_space<vmem>>, vector<128x384xbf16>
    %cst = arith.constant dense<0.000000e+00> : vector<32x384xf32>
    %5 = tpu.matmul %3, %4, %cst {dimension_numbers = #tpu.dot_dimension_numbers<[1], [0], [0], [1], [0, 0, 1, 1], [], []>} : vector<32x128xbf16>, vector<128x384xbf16>, vector<32x384xf32> -> vector<32x384xf32>
    %c0_4 = arith.constant 0 : index
    %c0_5 = arith.constant 0 : index
    %6 = vector.load %arg4[%c0_4, %c0_5] : memref<1x384xf32, #tpu.memory_space<vmem>>, vector<1x384xf32>
    %7 = vector.broadcast %6 : vector<1x384xf32> to vector<32x384xf32>
    %8 = arith.addf %5, %7 : vector<32x384xf32>
    %9 = arith.truncf %8 : vector<32x384xf32> to vector<32x384xbf16>
    %c0_6 = arith.constant 0 : index
    %c0_7 = arith.constant 0 : index
    %10 = vector.load %arg7[%c0_6, %c0_7] : memref<32x384xbf16, #tpu.memory_space<vmem>>, vector<32x384xbf16>
    tpu.vector_store %arg7[%c0_6, %c0_7], %9 {strides = array<i32>} : memref<32x384xbf16, #tpu.memory_space<vmem>>, vector<32x384xbf16>,
    return
  }
  func.func @transform_0(%arg0: i32, %arg1: i32) -> (i32, i32) {
    %c0_i32 = arith.constant 0 : i32
    %c0_i32_0 = arith.constant 0 : i32
    return %arg0, %c0_i32 : i32, i32
  }
  func.func @transform_1(%arg0: i32, %arg1: i32) -> (i32, i32) {
    %c0_i32 = arith.constant 0 : i32
    %c0_i32_0 = arith.constant 0 : i32
    return %c0_i32, %arg1 : i32, i32
  }
  func.func @transform_2(%arg0: i32, %arg1: i32) -> (i32, i32) {
    %c0_i32 = arith.constant 0 : i32
    %c0_i32_0 = arith.constant 0 : i32
    return %c0_i32, %arg1 : i32, i32
  }
  func.func @transform_3(%arg0: i32, %arg1: i32) -> (i32, i32) {
    %c0_i32 = arith.constant 0 : i32
    %c0_i32_0 = arith.constant 0 : i32
    %c0_i32_1 = arith.constant 0 : i32
    return %c0_i32, %c0_i32_0 : i32, i32
  }
  func.func @transform_4(%arg0: i32, %arg1: i32) -> (i32, i32) {
    %c0_i32 = arith.constant 0 : i32
    %c0_i32_0 = arith.constant 0 : i32
    %c0_i32_1 = arith.constant 0 : i32
    return %c0_i32, %c0_i32_0 : i32, i32
  }
  func.func @transform_5(%arg0: i32, %arg1: i32) -> (i32, i32) {
    %c0_i32 = arith.constant 0 : i32
    return %arg0, %arg1 : i32, i32
  }
}

module attributes {stable_mosaic.version = 11 : i64} {
  func.func @_attn_kernel(%arg0: i32, %arg1: memref<1x16x384xbf16, #tpu.memory_space<vmem>>, %arg2: memref<1x1x16xf32, #tpu.memory_space<vmem>>, %arg3: memref<1x16x128xbf16, #tpu.memory_space<vmem>>) attributes {dimension_semantics = [#tpu.dimension_semantics<parallel>], iteration_bounds = array<i64: 2>, scalar_prefetch = 0 : i64, scratch_operands = 0 : i64, tpu.core_type = #tpu.core_type<tc>, window_params = [{transform_indices = @transform_0, window_bounds = array<i64: 1, 16, 384>}, {transform_indices = @transform_1, window_bounds = array<i64: 1, 1, 16>}, {transform_indices = @transform_2, window_bounds = array<i64: 1, 16, 128>}]} {
    %c0 = arith.constant 0 : index
    %c0_0 = arith.constant 0 : index
    %c0_1 = arith.constant 0 : index
    %0 = vector.load %arg2[%c0, %c0_0, %c0_1] : memref<1x1x16xf32, #tpu.memory_space<vmem>>, vector<1x1x16xf32>
    %1 = vector.shape_cast %0 : vector<1x1x16xf32> to vector<1x16xf32>
    %c0_2 = arith.constant 0 : index
    %c0_3 = arith.constant 0 : index
    %c0_4 = arith.constant 0 : index
    %2 = vector.load %arg1[%c0_2, %c0_3, %c0_4] : memref<1x16x384xbf16, #tpu.memory_space<vmem>>, vector<1x16x32xbf16>
    %3 = vector.shape_cast %2 : vector<1x16x32xbf16> to vector<16x32xbf16>
    %c0_5 = arith.constant 0 : index
    %c0_6 = arith.constant 0 : index
    %c128 = arith.constant 128 : index
    %4 = vector.load %arg1[%c0_5, %c0_6, %c128] : memref<1x16x384xbf16, #tpu.memory_space<vmem>>, vector<1x16x32xbf16>
    %5 = vector.shape_cast %4 : vector<1x16x32xbf16> to vector<16x32xbf16>
    %c0_7 = arith.constant 0 : index
    %c0_8 = arith.constant 0 : index
    %c256 = arith.constant 256 : index
    %6 = vector.load %arg1[%c0_7, %c0_8, %c256] : memref<1x16x384xbf16, #tpu.memory_space<vmem>>, vector<1x16x32xbf16>
    %7 = vector.shape_cast %6 : vector<1x16x32xbf16> to vector<16x32xbf16>
    %cst = arith.constant dense<0.000000e+00> : vector<16x16xf32>
    %8 = tpu.matmul %3, %5, %cst {dimension_numbers = #tpu.dot_dimension_numbers<[1], [1], [0], [0], [0, 0, 1, 0], [], []>} : vector<16x32xbf16>, vector<16x32xbf16>, vector<16x16xf32> -> vector<16x16xf32>
    %9 = vector.broadcast %1 : vector<1x16xf32> to vector<16x16xf32>
    %10 = arith.addf %8, %9 : vector<16x16xf32>
    %cst_9 = arith.constant dense<0xFF800000> : vector<16xf32>
    %11 = vector.multi_reduction <maximumf>, %10, %cst_9 [1] : vector<16x16xf32> to vector<16xf32>
    %12 = vector.shape_cast %11 : vector<16xf32> to vector<16x1xf32>
    %13 = vector.broadcast %12 : vector<16x1xf32> to vector<16x16xf32>
    %14 = arith.subf %10, %13 : vector<16x16xf32>
    %15 = math.exp %14 : vector<16x16xf32>
    %cst_10 = arith.constant dense<0.000000e+00> : vector<16xf32>
    %16 = vector.multi_reduction <add>, %15, %cst_10 [1] : vector<16x16xf32> to vector<16xf32>
    %17 = vector.shape_cast %16 : vector<16xf32> to vector<16x1xf32>
    %18 = arith.truncf %15 : vector<16x16xf32> to vector<16x16xbf16>
    %cst_11 = arith.constant dense<0.000000e+00> : vector<16x32xf32>
    %19 = tpu.matmul %18, %7, %cst_11 {dimension_numbers = #tpu.dot_dimension_numbers<[1], [0], [0], [1], [0, 0, 1, 1], [], []>} : vector<16x16xbf16>, vector<16x32xbf16>, vector<16x32xf32> -> vector<16x32xf32>
    %20 = tpu.reciprocal %17 {approx = true} : vector<16x1xf32> -> vector<16x1xf32>
    %21 = vector.broadcast %20 : vector<16x1xf32> to vector<16x32xf32>
    %22 = arith.mulf %19, %21 : vector<16x32xf32>
    %c0_12 = arith.constant 0 : index
    %c0_13 = arith.constant 0 : index
    %c32 = arith.constant 32 : index
    %23 = vector.load %arg1[%c0_12, %c0_13, %c32] : memref<1x16x384xbf16, #tpu.memory_space<vmem>>, vector<1x16x32xbf16>
    %24 = vector.shape_cast %23 : vector<1x16x32xbf16> to vector<16x32xbf16>
    %c0_14 = arith.constant 0 : index
    %c0_15 = arith.constant 0 : index
    %c160 = arith.constant 160 : index
    %25 = vector.load %arg1[%c0_14, %c0_15, %c160] : memref<1x16x384xbf16, #tpu.memory_space<vmem>>, vector<1x16x32xbf16>
    %26 = vector.shape_cast %25 : vector<1x16x32xbf16> to vector<16x32xbf16>
    %c0_16 = arith.constant 0 : index
    %c0_17 = arith.constant 0 : index
    %c288 = arith.constant 288 : index
    %27 = vector.load %arg1[%c0_16, %c0_17, %c288] : memref<1x16x384xbf16, #tpu.memory_space<vmem>>, vector<1x16x32xbf16>
    %28 = vector.shape_cast %27 : vector<1x16x32xbf16> to vector<16x32xbf16>
    %cst_18 = arith.constant dense<0.000000e+00> : vector<16x16xf32>
    %29 = tpu.matmul %24, %26, %cst_18 {dimension_numbers = #tpu.dot_dimension_numbers<[1], [1], [0], [0], [0, 0, 1, 0], [], []>} : vector<16x32xbf16>, vector<16x32xbf16>, vector<16x16xf32> -> vector<16x16xf32>
    %30 = vector.broadcast %1 : vector<1x16xf32> to vector<16x16xf32>
    %31 = arith.addf %29, %30 : vector<16x16xf32>
    %cst_19 = arith.constant dense<0xFF800000> : vector<16xf32>
    %32 = vector.multi_reduction <maximumf>, %31, %cst_19 [1] : vector<16x16xf32> to vector<16xf32>
    %33 = vector.shape_cast %32 : vector<16xf32> to vector<16x1xf32>
    %34 = vector.broadcast %33 : vector<16x1xf32> to vector<16x16xf32>
    %35 = arith.subf %31, %34 : vector<16x16xf32>
    %36 = math.exp %35 : vector<16x16xf32>
    %cst_20 = arith.constant dense<0.000000e+00> : vector<16xf32>
    %37 = vector.multi_reduction <add>, %36, %cst_20 [1] : vector<16x16xf32> to vector<16xf32>
    %38 = vector.shape_cast %37 : vector<16xf32> to vector<16x1xf32>
    %39 = arith.truncf %36 : vector<16x16xf32> to vector<16x16xbf16>
    %cst_21 = arith.constant dense<0.000000e+00> : vector<16x32xf32>
    %40 = tpu.matmul %39, %28, %cst_21 {dimension_numbers = #tpu.dot_dimension_numbers<[1], [0], [0], [1], [0, 0, 1, 1], [], []>} : vector<16x16xbf16>, vector<16x32xbf16>, vector<16x32xf32> -> vector<16x32xf32>
    %41 = tpu.reciprocal %38 {approx = true} : vector<16x1xf32> -> vector<16x1xf32>
    %42 = vector.broadcast %41 : vector<16x1xf32> to vector<16x32xf32>
    %43 = arith.mulf %40, %42 : vector<16x32xf32>
    %c0_22 = arith.constant 0 : index
    %c0_23 = arith.constant 0 : index
    %c64 = arith.constant 64 : index
    %44 = vector.load %arg1[%c0_22, %c0_23, %c64] : memref<1x16x384xbf16, #tpu.memory_space<vmem>>, vector<1x16x32xbf16>
    %45 = vector.shape_cast %44 : vector<1x16x32xbf16> to vector<16x32xbf16>
    %c0_24 = arith.constant 0 : index
    %c0_25 = arith.constant 0 : index
    %c192 = arith.constant 192 : index
    %46 = vector.load %arg1[%c0_24, %c0_25, %c192] : memref<1x16x384xbf16, #tpu.memory_space<vmem>>, vector<1x16x32xbf16>
    %47 = vector.shape_cast %46 : vector<1x16x32xbf16> to vector<16x32xbf16>
    %c0_26 = arith.constant 0 : index
    %c0_27 = arith.constant 0 : index
    %c320 = arith.constant 320 : index
    %48 = vector.load %arg1[%c0_26, %c0_27, %c320] : memref<1x16x384xbf16, #tpu.memory_space<vmem>>, vector<1x16x32xbf16>
    %49 = vector.shape_cast %48 : vector<1x16x32xbf16> to vector<16x32xbf16>
    %cst_28 = arith.constant dense<0.000000e+00> : vector<16x16xf32>
    %50 = tpu.matmul %45, %47, %cst_28 {dimension_numbers = #tpu.dot_dimension_numbers<[1], [1], [0], [0], [0, 0, 1, 0], [], []>} : vector<16x32xbf16>, vector<16x32xbf16>, vector<16x16xf32> -> vector<16x16xf32>
    %51 = vector.broadcast %1 : vector<1x16xf32> to vector<16x16xf32>
    %52 = arith.addf %50, %51 : vector<16x16xf32>
    %cst_29 = arith.constant dense<0xFF800000> : vector<16xf32>
    %53 = vector.multi_reduction <maximumf>, %52, %cst_29 [1] : vector<16x16xf32> to vector<16xf32>
    %54 = vector.shape_cast %53 : vector<16xf32> to vector<16x1xf32>
    %55 = vector.broadcast %54 : vector<16x1xf32> to vector<16x16xf32>
    %56 = arith.subf %52, %55 : vector<16x16xf32>
    %57 = math.exp %56 : vector<16x16xf32>
    %cst_30 = arith.constant dense<0.000000e+00> : vector<16xf32>
    %58 = vector.multi_reduction <add>, %57, %cst_30 [1] : vector<16x16xf32> to vector<16xf32>
    %59 = vector.shape_cast %58 : vector<16xf32> to vector<16x1xf32>
    %60 = arith.truncf %57 : vector<16x16xf32> to vector<16x16xbf16>
    %cst_31 = arith.constant dense<0.000000e+00> : vector<16x32xf32>
    %61 = tpu.matmul %60, %49, %cst_31 {dimension_numbers = #tpu.dot_dimension_numbers<[1], [0], [0], [1], [0, 0, 1, 1], [], []>} : vector<16x16xbf16>, vector<16x32xbf16>, vector<16x32xf32> -> vector<16x32xf32>
    %62 = tpu.reciprocal %59 {approx = true} : vector<16x1xf32> -> vector<16x1xf32>
    %63 = vector.broadcast %62 : vector<16x1xf32> to vector<16x32xf32>
    %64 = arith.mulf %61, %63 : vector<16x32xf32>
    %c0_32 = arith.constant 0 : index
    %c0_33 = arith.constant 0 : index
    %c96 = arith.constant 96 : index
    %65 = vector.load %arg1[%c0_32, %c0_33, %c96] : memref<1x16x384xbf16, #tpu.memory_space<vmem>>, vector<1x16x32xbf16>
    %66 = vector.shape_cast %65 : vector<1x16x32xbf16> to vector<16x32xbf16>
    %c0_34 = arith.constant 0 : index
    %c0_35 = arith.constant 0 : index
    %c224 = arith.constant 224 : index
    %67 = vector.load %arg1[%c0_34, %c0_35, %c224] : memref<1x16x384xbf16, #tpu.memory_space<vmem>>, vector<1x16x32xbf16>
    %68 = vector.shape_cast %67 : vector<1x16x32xbf16> to vector<16x32xbf16>
    %c0_36 = arith.constant 0 : index
    %c0_37 = arith.constant 0 : index
    %c352 = arith.constant 352 : index
    %69 = vector.load %arg1[%c0_36, %c0_37, %c352] : memref<1x16x384xbf16, #tpu.memory_space<vmem>>, vector<1x16x32xbf16>
    %70 = vector.shape_cast %69 : vector<1x16x32xbf16> to vector<16x32xbf16>
    %cst_38 = arith.constant dense<0.000000e+00> : vector<16x16xf32>
    %71 = tpu.matmul %66, %68, %cst_38 {dimension_numbers = #tpu.dot_dimension_numbers<[1], [1], [0], [0], [0, 0, 1, 0], [], []>} : vector<16x32xbf16>, vector<16x32xbf16>, vector<16x16xf32> -> vector<16x16xf32>
    %72 = vector.broadcast %1 : vector<1x16xf32> to vector<16x16xf32>
    %73 = arith.addf %71, %72 : vector<16x16xf32>
    %cst_39 = arith.constant dense<0xFF800000> : vector<16xf32>
    %74 = vector.multi_reduction <maximumf>, %73, %cst_39 [1] : vector<16x16xf32> to vector<16xf32>
    %75 = vector.shape_cast %74 : vector<16xf32> to vector<16x1xf32>
    %76 = vector.broadcast %75 : vector<16x1xf32> to vector<16x16xf32>
    %77 = arith.subf %73, %76 : vector<16x16xf32>
    %78 = math.exp %77 : vector<16x16xf32>
    %cst_40 = arith.constant dense<0.000000e+00> : vector<16xf32>
    %79 = vector.multi_reduction <add>, %78, %cst_40 [1] : vector<16x16xf32> to vector<16xf32>
    %80 = vector.shape_cast %79 : vector<16xf32> to vector<16x1xf32>
    %81 = arith.truncf %78 : vector<16x16xf32> to vector<16x16xbf16>
    %cst_41 = arith.constant dense<0.000000e+00> : vector<16x32xf32>
    %82 = tpu.matmul %81, %70, %cst_41 {dimension_numbers = #tpu.dot_dimension_numbers<[1], [0], [0], [1], [0, 0, 1, 1], [], []>} : vector<16x16xbf16>, vector<16x32xbf16>, vector<16x32xf32> -> vector<16x32xf32>
    %83 = tpu.reciprocal %80 {approx = true} : vector<16x1xf32> -> vector<16x1xf32>
    %84 = vector.broadcast %83 : vector<16x1xf32> to vector<16x32xf32>
    %85 = arith.mulf %82, %84 : vector<16x32xf32>
    %86 = tpu.concatenate %22, %43, %64, %85 in 1 : vector<16x32xf32>, vector<16x32xf32>, vector<16x32xf32>, vector<16x32xf32> -> vector<16x128xf32>
    %87 = arith.truncf %86 : vector<16x128xf32> to vector<16x128xbf16>
    %c0_42 = arith.constant 0 : index
    %c0_43 = arith.constant 0 : index
    %c0_44 = arith.constant 0 : index
    %88 = vector.load %arg3[%c0_42, %c0_43, %c0_44] : memref<1x16x128xbf16, #tpu.memory_space<vmem>>, vector<1x16x128xbf16>
    %89 = vector.shape_cast %88 : vector<1x16x128xbf16> to vector<16x128xbf16>
    %90 = vector.shape_cast %87 : vector<16x128xbf16> to vector<1x16x128xbf16>
    tpu.vector_store %arg3[%c0_42, %c0_43, %c0_44], %90 {strides = array<i32>} : memref<1x16x128xbf16, #tpu.memory_space<vmem>>, vector<1x16x128xbf16>,
    return
  }
  func.func @transform_0(%arg0: i32) -> (i32, i32, i32) {
    %c0_i32 = arith.constant 0 : i32
    %c0_i32_0 = arith.constant 0 : i32
    %c0_i32_1 = arith.constant 0 : i32
    return %arg0, %c0_i32, %c0_i32_0 : i32, i32, i32
  }
  func.func @transform_1(%arg0: i32) -> (i32, i32, i32) {
    %c0_i32 = arith.constant 0 : i32
    %c0_i32_0 = arith.constant 0 : i32
    %c0_i32_1 = arith.constant 0 : i32
    return %arg0, %c0_i32, %c0_i32_0 : i32, i32, i32
  }
  func.func @transform_2(%arg0: i32) -> (i32, i32, i32) {
    %c0_i32 = arith.constant 0 : i32
    %c0_i32_0 = arith.constant 0 : i32
    %c0_i32_1 = arith.constant 0 : i32
    return %arg0, %c0_i32, %c0_i32_0 : i32, i32, i32
  }
}

module attributes {stable_mosaic.version = 11 : i64} {
  func.func @_fused_linear_kernel(%arg0: i32, %arg1: i32, %arg2: memref<32x128xbf16, #tpu.memory_space<vmem>>, %arg3: memref<128x128xbf16, #tpu.memory_space<vmem>>, %arg4: memref<1x128xf32, #tpu.memory_space<vmem>>, %arg5: memref<32x128xbf16, #tpu.memory_space<vmem>>, %arg6: memref<32x128xbf16, #tpu.memory_space<vmem>>) attributes {dimension_semantics = [#tpu.dimension_semantics<parallel>, #tpu.dimension_semantics<arbitrary>], iteration_bounds = array<i64: 1, 1>, scalar_prefetch = 0 : i64, scratch_operands = 0 : i64, tpu.core_type = #tpu.core_type<tc>, window_params = [{transform_indices = @transform_0, window_bounds = array<i64: 32, 128>}, {transform_indices = @transform_1, window_bounds = array<i64: 128, 128>}, {transform_indices = @transform_2, window_bounds = array<i64: 1, 128>}, {transform_indices = @transform_3, window_bounds = array<i64: 32, 128>}, {transform_indices = @transform_4, window_bounds = array<i64: 32, 128>}]} {
    %c0 = arith.constant 0 : index
    %c0_0 = arith.constant 0 : index
    %0 = vector.load %arg2[%c0, %c0_0] : memref<32x128xbf16, #tpu.memory_space<vmem>>, vector<32x128xbf16>
    %c0_1 = arith.constant 0 : index
    %c0_2 = arith.constant 0 : index
    %1 = vector.load %arg3[%c0_1, %c0_2] : memref<128x128xbf16, #tpu.memory_space<vmem>>, vector<128x128xbf16>
    %cst = arith.constant dense<0.000000e+00> : vector<32x128xf32>
    %2 = tpu.matmul %0, %1, %cst {dimension_numbers = #tpu.dot_dimension_numbers<[1], [0], [0], [1], [0, 0, 1, 1], [], []>} : vector<32x128xbf16>, vector<128x128xbf16>, vector<32x128xf32> -> vector<32x128xf32>
    %c0_3 = arith.constant 0 : index
    %c0_4 = arith.constant 0 : index
    %3 = vector.load %arg4[%c0_3, %c0_4] : memref<1x128xf32, #tpu.memory_space<vmem>>, vector<1x128xf32>
    %4 = vector.broadcast %3 : vector<1x128xf32> to vector<32x128xf32>
    %5 = arith.addf %2, %4 : vector<32x128xf32>
    %c0_5 = arith.constant 0 : index
    %c0_6 = arith.constant 0 : index
    %6 = vector.load %arg5[%c0_5, %c0_6] : memref<32x128xbf16, #tpu.memory_space<vmem>>, vector<32x128xbf16>
    %7 = arith.extf %6 : vector<32x128xbf16> to vector<32x128xf32>
    %8 = arith.addf %5, %7 : vector<32x128xf32>
    %9 = arith.truncf %8 : vector<32x128xf32> to vector<32x128xbf16>
    %c0_7 = arith.constant 0 : index
    %c0_8 = arith.constant 0 : index
    %10 = vector.load %arg6[%c0_7, %c0_8] : memref<32x128xbf16, #tpu.memory_space<vmem>>, vector<32x128xbf16>
    tpu.vector_store %arg6[%c0_7, %c0_8], %9 {strides = array<i32>} : memref<32x128xbf16, #tpu.memory_space<vmem>>, vector<32x128xbf16>,
    return
  }
  func.func @transform_0(%arg0: i32, %arg1: i32) -> (i32, i32) {
    %c0_i32 = arith.constant 0 : i32
    %c0_i32_0 = arith.constant 0 : i32
    return %arg0, %c0_i32 : i32, i32
  }
  func.func @transform_1(%arg0: i32, %arg1: i32) -> (i32, i32) {
    %c0_i32 = arith.constant 0 : i32
    %c0_i32_0 = arith.constant 0 : i32
    return %c0_i32, %arg1 : i32, i32
  }
  func.func @transform_2(%arg0: i32, %arg1: i32) -> (i32, i32) {
    %c0_i32 = arith.constant 0 : i32
    %c0_i32_0 = arith.constant 0 : i32
    return %c0_i32, %arg1 : i32, i32
  }
  func.func @transform_3(%arg0: i32, %arg1: i32) -> (i32, i32) {
    %c0_i32 = arith.constant 0 : i32
    return %arg0, %arg1 : i32, i32
  }
  func.func @transform_4(%arg0: i32, %arg1: i32) -> (i32, i32) {
    %c0_i32 = arith.constant 0 : i32
    return %arg0, %arg1 : i32, i32
  }
}

module attributes {stable_mosaic.version = 11 : i64} {
  func.func @_mlp_kernel(%arg0: i32, %arg1: i32, %arg2: memref<32x128xbf16, #tpu.memory_space<vmem>>, %arg3: memref<128x256xbf16, #tpu.memory_space<vmem>>, %arg4: memref<1x256xf32, #tpu.memory_space<vmem>>, %arg5: memref<256x128xbf16, #tpu.memory_space<vmem>>, %arg6: memref<1x128xf32, #tpu.memory_space<vmem>>, %arg7: memref<1x128xf32, #tpu.memory_space<vmem>>, %arg8: memref<1x128xf32, #tpu.memory_space<vmem>>, %arg9: memref<32x128xbf16, #tpu.memory_space<vmem>>, %arg10: memref<32x128xbf16, #tpu.memory_space<vmem>>, %arg11: memref<32x128xf32, #tpu.memory_space<vmem>>) attributes {dimension_semantics = [#tpu.dimension_semantics<parallel>, #tpu.dimension_semantics<arbitrary>], iteration_bounds = array<i64: 1, 1>, scalar_prefetch = 0 : i64, scratch_operands = 2 : i64, tpu.core_type = #tpu.core_type<tc>, window_params = [{transform_indices = @transform_0, window_bounds = array<i64: 32, 128>}, {transform_indices = @transform_1, window_bounds = array<i64: 128, 256>}, {transform_indices = @transform_2, window_bounds = array<i64: 1, 256>}, {transform_indices = @transform_3, window_bounds = array<i64: 256, 128>}, {pipeline_mode = #tpu.pipeline_mode<synchronous>, transform_indices = @transform_4, window_bounds = array<i64: 1, 128>}, {pipeline_mode = #tpu.pipeline_mode<synchronous>, transform_indices = @transform_5, window_bounds = array<i64: 1, 128>}, {pipeline_mode = #tpu.pipeline_mode<synchronous>, transform_indices = @transform_6, window_bounds = array<i64: 1, 128>}, {transform_indices = @transform_7, window_bounds = array<i64: 32, 128>}]} {
    %c0_i32 = arith.constant 0 : i32
    %0 = arith.cmpi eq, %arg1, %c0_i32 : i32
    %1 = arith.extui %0 : i1 to i32
    %c0_i32_0 = arith.constant 0 : i32
    %2 = arith.cmpi ne, %1, %c0_i32_0 : i32
    scf.if %2 {
      %c0_18 = arith.constant 0 : index
      %c0_19 = arith.constant 0 : index
      %26 = vector.load %arg2[%c0_18, %c0_19] : memref<32x128xbf16, #tpu.memory_space<vmem>>, vector<32x128xbf16>
      %27 = arith.extf %26 : vector<32x128xbf16> to vector<32x128xf32>
      %cst_20 = arith.constant dense<0.000000e+00> : vector<32xf32>
      %28 = vector.multi_reduction <add>, %27, %cst_20 [1] : vector<32x128xf32> to vector<32xf32>
      %29 = vector.shape_cast %28 : vector<32xf32> to vector<32x1xf32>
      %cst_21 = arith.constant 1.280000e+02 : f32
      %30 = vector.broadcast %cst_21 : f32 to vector<32x1xf32>
      %31 = arith.divf %29, %30 : vector<32x1xf32>
      %32 = vector.broadcast %31 : vector<32x1xf32> to vector<32x128xf32>
      %33 = arith.subf %27, %32 : vector<32x128xf32>
      %34 = arith.mulf %33, %33 : vector<32x128xf32>
      %cst_22 = arith.constant dense<0.000000e+00> : vector<32xf32>
      %35 = vector.multi_reduction <add>, %34, %cst_22 [1] : vector<32x128xf32> to vector<32xf32>
      %36 = vector.shape_cast %35 : vector<32xf32> to vector<32x1xf32>
      %cst_23 = arith.constant 1.280000e+02 : f32
      %37 = vector.broadcast %cst_23 : f32 to vector<32x1xf32>
      %38 = arith.divf %36, %37 : vector<32x1xf32>
      %39 = vector.broadcast %31 : vector<32x1xf32> to vector<32x128xf32>
      %40 = arith.subf %27, %39 : vector<32x128xf32>
      %cst_24 = arith.constant 9.99999996E-13 : f32
      %41 = vector.broadcast %cst_24 : f32 to vector<32x1xf32>
      %42 = arith.addf %38, %41 : vector<32x1xf32>
      %43 = math.rsqrt %42 : vector<32x1xf32>
      %44 = vector.broadcast %43 : vector<32x1xf32> to vector<32x128xf32>
      %45 = arith.mulf %40, %44 : vector<32x128xf32>
      %c0_25 = arith.constant 0 : index
      %c0_26 = arith.constant 0 : index
      %46 = vector.load %arg7[%c0_25, %c0_26] : memref<1x128xf32, #tpu.memory_space<vmem>>, vector<1x128xf32>
      %47 = vector.broadcast %46 : vector<1x128xf32> to vector<32x128xf32>
      %48 = arith.mulf %45, %47 : vector<32x128xf32>
      %c0_27 = arith.constant 0 : index
      %c0_28 = arith.constant 0 : index
      %49 = vector.load %arg8[%c0_27, %c0_28] : memref<1x128xf32, #tpu.memory_space<vmem>>, vector<1x128xf32>
      %50 = vector.broadcast %49 : vector<1x128xf32> to vector<32x128xf32>
      %51 = arith.addf %48, %50 : vector<32x128xf32>
      %52 = arith.truncf %51 : vector<32x128xf32> to vector<32x128xbf16>
      %c0_29 = arith.constant 0 : index
      %c0_30 = arith.constant 0 : index
      %53 = vector.load %arg10[%c0_29, %c0_30] : memref<32x128xbf16, #tpu.memory_space<vmem>>, vector<32x128xbf16>
      tpu.vector_store %arg10[%c0_29, %c0_30], %52 {strides = array<i32>} : memref<32x128xbf16, #tpu.memory_space<vmem>>, vector<32x128xbf16>,
      %cst_31 = arith.constant 0.000000e+00 : f32
      %54 = vector.broadcast %cst_31 : f32 to vector<32x128xf32>
      %c0_32 = arith.constant 0 : index
      %c0_33 = arith.constant 0 : index
      %55 = vector.load %arg11[%c0_32, %c0_33] : memref<32x128xf32, #tpu.memory_space<vmem>>, vector<32x128xf32>
      tpu.vector_store %arg11[%c0_32, %c0_33], %54 {strides = array<i32>} : memref<32x128xf32, #tpu.memory_space<vmem>>, vector<32x128xf32>,
    } else {
    }
    %c0 = arith.constant 0 : index
    %c0_1 = arith.constant 0 : index
    %3 = vector.load %arg10[%c0, %c0_1] : memref<32x128xbf16, #tpu.memory_space<vmem>>, vector<32x128xbf16>
    %c0_2 = arith.constant 0 : index
    %c0_3 = arith.constant 0 : index
    %4 = vector.load %arg3[%c0_2, %c0_3] : memref<128x256xbf16, #tpu.memory_space<vmem>>, vector<128x256xbf16>
    %cst = arith.constant dense<0.000000e+00> : vector<32x256xf32>
    %5 = tpu.matmul %3, %4, %cst {dimension_numbers = #tpu.dot_dimension_numbers<[1], [0], [0], [1], [0, 0, 1, 1], [], []>} : vector<32x128xbf16>, vector<128x256xbf16>, vector<32x256xf32> -> vector<32x256xf32>
    %c0_4 = arith.constant 0 : index
    %c0_5 = arith.constant 0 : index
    %6 = vector.load %arg4[%c0_4, %c0_5] : memref<1x256xf32, #tpu.memory_space<vmem>>, vector<1x256xf32>
    %7 = vector.broadcast %6 : vector<1x256xf32> to vector<32x256xf32>
    %8 = arith.addf %5, %7 : vector<32x256xf32>
    %cst_6 = arith.constant 5.000000e-01 : f32
    %9 = vector.broadcast %cst_6 : f32 to vector<32x256xf32>
    %10 = arith.mulf %9, %8 : vector<32x256xf32>
    %cst_7 = arith.constant 0.707106769 : f32
    %11 = vector.broadcast %cst_7 : f32 to vector<32x256xf32>
    %12 = arith.mulf %8, %11 : vector<32x256xf32>
    %13 = math.erf %12 : vector<32x256xf32>
    %cst_8 = arith.constant 1.000000e+00 : f32
    %14 = vector.broadcast %cst_8 : f32 to vector<32x256xf32>
    %15 = arith.addf %14, %13 : vector<32x256xf32>
    %16 = arith.mulf %10, %15 : vector<32x256xf32>
    %c0_9 = arith.constant 0 : index
    %c0_10 = arith.constant 0 : index
    %17 = vector.load %arg11[%c0_9, %c0_10] : memref<32x128xf32, #tpu.memory_space<vmem>>, vector<32x128xf32>
    %18 = arith.truncf %16 : vector<32x256xf32> to vector<32x256xbf16>
    %c0_11 = arith.constant 0 : index
    %c0_12 = arith.constant 0 : index
    %19 = vector.load %arg5[%c0_11, %c0_12] : memref<256x128xbf16, #tpu.memory_space<vmem>>, vector<256x128xbf16>
    %cst_13 = arith.constant dense<0.000000e+00> : vector<32x128xf32>
    %20 = tpu.matmul %18, %19, %cst_13 {dimension_numbers = #tpu.dot_dimension_numbers<[1], [0], [0], [1], [0, 0, 1, 1], [], []>} : vector<32x256xbf16>, vector<256x128xbf16>, vector<32x128xf32> -> vector<32x128xf32>
    %21 = arith.addf %17, %20 : vector<32x128xf32>
    %c0_14 = arith.constant 0 : index
    %c0_15 = arith.constant 0 : index
    %22 = vector.load %arg11[%c0_14, %c0_15] : memref<32x128xf32, #tpu.memory_space<vmem>>, vector<32x128xf32>
    tpu.vector_store %arg11[%c0_14, %c0_15], %21 {strides = array<i32>} : memref<32x128xf32, #tpu.memory_space<vmem>>, vector<32x128xf32>,
    %c0_i32_16 = arith.constant 0 : i32
    %23 = arith.cmpi eq, %arg1, %c0_i32_16 : i32
    %24 = arith.extui %23 : i1 to i32
    %c0_i32_17 = arith.constant 0 : i32
    %25 = arith.cmpi ne, %24, %c0_i32_17 : i32
    scf.if %25 {
      %c0_18 = arith.constant 0 : index
      %c0_19 = arith.constant 0 : index
      %26 = vector.load %arg11[%c0_18, %c0_19] : memref<32x128xf32, #tpu.memory_space<vmem>>, vector<32x128xf32>
      %c0_20 = arith.constant 0 : index
      %c0_21 = arith.constant 0 : index
      %27 = vector.load %arg6[%c0_20, %c0_21] : memref<1x128xf32, #tpu.memory_space<vmem>>, vector<1x128xf32>
      %28 = vector.broadcast %27 : vector<1x128xf32> to vector<32x128xf32>
      %29 = arith.addf %26, %28 : vector<32x128xf32>
      %c0_22 = arith.constant 0 : index
      %c0_23 = arith.constant 0 : index
      %30 = vector.load %arg2[%c0_22, %c0_23] : memref<32x128xbf16, #tpu.memory_space<vmem>>, vector<32x128xbf16>
      %31 = arith.extf %30 : vector<32x128xbf16> to vector<32x128xf32>
      %32 = arith.addf %29, %31 : vector<32x128xf32>
      %33 = arith.truncf %32 : vector<32x128xf32> to vector<32x128xbf16>
      %c0_24 = arith.constant 0 : index
      %c0_25 = arith.constant 0 : index
      %34 = vector.load %arg9[%c0_24, %c0_25] : memref<32x128xbf16, #tpu.memory_space<vmem>>, vector<32x128xbf16>
      tpu.vector_store %arg9[%c0_24, %c0_25], %33 {strides = array<i32>} : memref<32x128xbf16, #tpu.memory_space<vmem>>, vector<32x128xbf16>,
    } else {
    }
    return
  }
  func.func @transform_0(%arg0: i32, %arg1: i32) -> (i32, i32) {
    %c0_i32 = arith.constant 0 : i32
    %c0_i32_0 = arith.constant 0 : i32
    return %arg0, %c0_i32 : i32, i32
  }
  func.func @transform_1(%arg0: i32, %arg1: i32) -> (i32, i32) {
    %c0_i32 = arith.constant 0 : i32
    %c0_i32_0 = arith.constant 0 : i32
    return %c0_i32, %arg1 : i32, i32
  }
  func.func @transform_2(%arg0: i32, %arg1: i32) -> (i32, i32) {
    %c0_i32 = arith.constant 0 : i32
    %c0_i32_0 = arith.constant 0 : i32
    return %c0_i32, %arg1 : i32, i32
  }
  func.func @transform_3(%arg0: i32, %arg1: i32) -> (i32, i32) {
    %c0_i32 = arith.constant 0 : i32
    %c0_i32_0 = arith.constant 0 : i32
    return %arg1, %c0_i32 : i32, i32
  }
  func.func @transform_4(%arg0: i32, %arg1: i32) -> (i32, i32) {
    %c0_i32 = arith.constant 0 : i32
    %c0_i32_0 = arith.constant 0 : i32
    %c0_i32_1 = arith.constant 0 : i32
    return %c0_i32, %c0_i32_0 : i32, i32
  }
  func.func @transform_5(%arg0: i32, %arg1: i32) -> (i32, i32) {
    %c0_i32 = arith.constant 0 : i32
    %c0_i32_0 = arith.constant 0 : i32
    %c0_i32_1 = arith.constant 0 : i32
    return %c0_i32, %c0_i32_0 : i32, i32
  }
  func.func @transform_6(%arg0: i32, %arg1: i32) -> (i32, i32) {
    %c0_i32 = arith.constant 0 : i32
    %c0_i32_0 = arith.constant 0 : i32
    %c0_i32_1 = arith.constant 0 : i32
    return %c0_i32, %c0_i32_0 : i32, i32
  }
  func.func @transform_7(%arg0: i32, %arg1: i32) -> (i32, i32) {
    %c0_i32 = arith.constant 0 : i32
    %c0_i32_0 = arith.constant 0 : i32
    return %arg0, %c0_i32 : i32, i32
  }
}

module attributes {stable_mosaic.version = 11 : i64} {
  func.func @_head_kernel(%arg0: i32, %arg1: memref<2x128xbf16, #tpu.memory_space<vmem>>, %arg2: memref<1x128xf32, #tpu.memory_space<vmem>>, %arg3: memref<1x128xf32, #tpu.memory_space<vmem>>, %arg4: memref<128x128xbf16, #tpu.memory_space<vmem>>, %arg5: memref<1x128xf32, #tpu.memory_space<vmem>>, %arg6: memref<128x128xbf16, #tpu.memory_space<vmem>>, %arg7: memref<1x128xf32, #tpu.memory_space<vmem>>, %arg8: memref<2x128xf32, #tpu.memory_space<vmem>>) attributes {dimension_semantics = [#tpu.dimension_semantics<arbitrary>], iteration_bounds = array<i64: 1>, scalar_prefetch = 0 : i64, scratch_operands = 0 : i64, tpu.core_type = #tpu.core_type<tc>, window_params = [{pipeline_mode = #tpu.pipeline_mode<synchronous>, transform_indices = @transform_0, window_bounds = array<i64: 2, 128>}, {pipeline_mode = #tpu.pipeline_mode<synchronous>, transform_indices = @transform_1, window_bounds = array<i64: 1, 128>}, {pipeline_mode = #tpu.pipeline_mode<synchronous>, transform_indices = @transform_2, window_bounds = array<i64: 1, 128>}, {pipeline_mode = #tpu.pipeline_mode<synchronous>, transform_indices = @transform_3, window_bounds = array<i64: 128, 128>}, {pipeline_mode = #tpu.pipeline_mode<synchronous>, transform_indices = @transform_4, window_bounds = array<i64: 1, 128>}, {pipeline_mode = #tpu.pipeline_mode<synchronous>, transform_indices = @transform_5, window_bounds = array<i64: 128, 128>}, {pipeline_mode = #tpu.pipeline_mode<synchronous>, transform_indices = @transform_6, window_bounds = array<i64: 1, 128>}, {pipeline_mode = #tpu.pipeline_mode<synchronous>, transform_indices = @transform_7, window_bounds = array<i64: 2, 128>}]} {
    %c0 = arith.constant 0 : index
    %c0_0 = arith.constant 0 : index
    %0 = vector.load %arg1[%c0, %c0_0] : memref<2x128xbf16, #tpu.memory_space<vmem>>, vector<2x128xbf16>
    %1 = arith.extf %0 : vector<2x128xbf16> to vector<2x128xf32>
    %cst = arith.constant dense<0.000000e+00> : vector<2xf32>
    %2 = vector.multi_reduction <add>, %1, %cst [1] : vector<2x128xf32> to vector<2xf32>
    %3 = vector.shape_cast %2 : vector<2xf32> to vector<2x1xf32>
    %cst_1 = arith.constant 1.280000e+02 : f32
    %4 = vector.broadcast %cst_1 : f32 to vector<2x1xf32>
    %5 = arith.divf %3, %4 : vector<2x1xf32>
    %6 = vector.broadcast %5 : vector<2x1xf32> to vector<2x128xf32>
    %7 = arith.subf %1, %6 : vector<2x128xf32>
    %8 = arith.mulf %7, %7 : vector<2x128xf32>
    %cst_2 = arith.constant dense<0.000000e+00> : vector<2xf32>
    %9 = vector.multi_reduction <add>, %8, %cst_2 [1] : vector<2x128xf32> to vector<2xf32>
    %10 = vector.shape_cast %9 : vector<2xf32> to vector<2x1xf32>
    %cst_3 = arith.constant 1.280000e+02 : f32
    %11 = vector.broadcast %cst_3 : f32 to vector<2x1xf32>
    %12 = arith.divf %10, %11 : vector<2x1xf32>
    %13 = vector.broadcast %5 : vector<2x1xf32> to vector<2x128xf32>
    %14 = arith.subf %1, %13 : vector<2x128xf32>
    %cst_4 = arith.constant 9.99999996E-13 : f32
    %15 = vector.broadcast %cst_4 : f32 to vector<2x1xf32>
    %16 = arith.addf %12, %15 : vector<2x1xf32>
    %17 = math.rsqrt %16 : vector<2x1xf32>
    %18 = vector.broadcast %17 : vector<2x1xf32> to vector<2x128xf32>
    %19 = arith.mulf %14, %18 : vector<2x128xf32>
    %c0_5 = arith.constant 0 : index
    %c0_6 = arith.constant 0 : index
    %20 = vector.load %arg2[%c0_5, %c0_6] : memref<1x128xf32, #tpu.memory_space<vmem>>, vector<1x128xf32>
    %21 = vector.broadcast %20 : vector<1x128xf32> to vector<2x128xf32>
    %22 = arith.mulf %19, %21 : vector<2x128xf32>
    %c0_7 = arith.constant 0 : index
    %c0_8 = arith.constant 0 : index
    %23 = vector.load %arg3[%c0_7, %c0_8] : memref<1x128xf32, #tpu.memory_space<vmem>>, vector<1x128xf32>
    %24 = vector.broadcast %23 : vector<1x128xf32> to vector<2x128xf32>
    %25 = arith.addf %22, %24 : vector<2x128xf32>
    %26 = arith.truncf %25 : vector<2x128xf32> to vector<2x128xbf16>
    %c0_9 = arith.constant 0 : index
    %c0_10 = arith.constant 0 : index
    %27 = vector.load %arg4[%c0_9, %c0_10] : memref<128x128xbf16, #tpu.memory_space<vmem>>, vector<128x128xbf16>
    %cst_11 = arith.constant dense<0.000000e+00> : vector<2x128xf32>
    %28 = tpu.matmul %26, %27, %cst_11 {dimension_numbers = #tpu.dot_dimension_numbers<[1], [0], [0], [1], [0, 0, 1, 1], [], []>} : vector<2x128xbf16>, vector<128x128xbf16>, vector<2x128xf32> -> vector<2x128xf32>
    %c0_12 = arith.constant 0 : index
    %c0_13 = arith.constant 0 : index
    %29 = vector.load %arg5[%c0_12, %c0_13] : memref<1x128xf32, #tpu.memory_space<vmem>>, vector<1x128xf32>
    %30 = vector.broadcast %29 : vector<1x128xf32> to vector<2x128xf32>
    %31 = arith.addf %28, %30 : vector<2x128xf32>
    %32 = math.tanh %31 : vector<2x128xf32>
    %33 = arith.truncf %32 : vector<2x128xf32> to vector<2x128xbf16>
    %c0_14 = arith.constant 0 : index
    %c0_15 = arith.constant 0 : index
    %34 = vector.load %arg6[%c0_14, %c0_15] : memref<128x128xbf16, #tpu.memory_space<vmem>>, vector<128x128xbf16>
    %cst_16 = arith.constant dense<0.000000e+00> : vector<2x128xf32>
    %35 = tpu.matmul %33, %34, %cst_16 {dimension_numbers = #tpu.dot_dimension_numbers<[1], [0], [0], [1], [0, 0, 1, 1], [], []>} : vector<2x128xbf16>, vector<128x128xbf16>, vector<2x128xf32> -> vector<2x128xf32>
    %c0_17 = arith.constant 0 : index
    %c0_18 = arith.constant 0 : index
    %36 = vector.load %arg7[%c0_17, %c0_18] : memref<1x128xf32, #tpu.memory_space<vmem>>, vector<1x128xf32>
    %37 = vector.broadcast %36 : vector<1x128xf32> to vector<2x128xf32>
    %38 = arith.addf %35, %37 : vector<2x128xf32>
    %c0_19 = arith.constant 0 : index
    %c0_20 = arith.constant 0 : index
    %39 = vector.load %arg8[%c0_19, %c0_20] : memref<2x128xf32, #tpu.memory_space<vmem>>, vector<2x128xf32>
    tpu.vector_store %arg8[%c0_19, %c0_20], %38 {strides = array<i32>} : memref<2x128xf32, #tpu.memory_space<vmem>>, vector<2x128xf32>,
    return
  }
  func.func @transform_0(%arg0: i32) -> (i32, i32) {
    %c0_i32 = arith.constant 0 : i32
    %c0_i32_0 = arith.constant 0 : i32
    %c0_i32_1 = arith.constant 0 : i32
    return %c0_i32, %c0_i32_0 : i32, i32
  }
  func.func @transform_1(%arg0: i32) -> (i32, i32) {
    %c0_i32 = arith.constant 0 : i32
    %c0_i32_0 = arith.constant 0 : i32
    %c0_i32_1 = arith.constant 0 : i32
    return %c0_i32, %c0_i32_0 : i32, i32
  }
  func.func @transform_2(%arg0: i32) -> (i32, i32) {
    %c0_i32 = arith.constant 0 : i32
    %c0_i32_0 = arith.constant 0 : i32
    %c0_i32_1 = arith.constant 0 : i32
    return %c0_i32, %c0_i32_0 : i32, i32
  }
  func.func @transform_3(%arg0: i32) -> (i32, i32) {
    %c0_i32 = arith.constant 0 : i32
    %c0_i32_0 = arith.constant 0 : i32
    %c0_i32_1 = arith.constant 0 : i32
    return %c0_i32, %c0_i32_0 : i32, i32
  }
  func.func @transform_4(%arg0: i32) -> (i32, i32) {
    %c0_i32 = arith.constant 0 : i32
    %c0_i32_0 = arith.constant 0 : i32
    %c0_i32_1 = arith.constant 0 : i32
    return %c0_i32, %c0_i32_0 : i32, i32
  }
  func.func @transform_5(%arg0: i32) -> (i32, i32) {
    %c0_i32 = arith.constant 0 : i32
    %c0_i32_0 = arith.constant 0 : i32
    %c0_i32_1 = arith.constant 0 : i32
    return %c0_i32, %c0_i32_0 : i32, i32
  }
  func.func @transform_6(%arg0: i32) -> (i32, i32) {
    %c0_i32 = arith.constant 0 : i32
    %c0_i32_0 = arith.constant 0 : i32
    %c0_i32_1 = arith.constant 0 : i32
    return %c0_i32, %c0_i32_0 : i32, i32
  }
  func.func @transform_7(%arg0: i32) -> (i32, i32) {
    %c0_i32 = arith.constant 0 : i32
    %c0_i32_0 = arith.constant 0 : i32
    %c0_i32_1 = arith.constant 0 : i32
    return %c0_i32, %c0_i32_0 : i32, i32
  }
}

</mosaic_0001>

<bundles_post_ra>
// kernel: vilt_meme_sentiment_forward.12
= control target key start
LH: loop header
LB: loop body
LE: loop exit
PB: predicated region body
PF: predicated region fallthrough
CT: control target
= control target key end

     0   :  { %s894_s1 = inlined_call_operand.vmem [shape: bf16[768,128], index: 1, kind: input, shape index: {}]   ;;  %s895_s0 = inlined_call_operand.vmem [shape: f32[8,768], index: 0, kind: input, shape index: {}]   ;;  %s896_s2 = inlined_call_operand.vmem [shape: f32[1,128], index: 2, kind: input, shape index: {}]   ;;  %s897_s3 = inlined_call_operand.vmem [shape: f32[8,128], index: 3, kind: output, shape index: {}]  }
   0x1   :  { %v658_v0 = vld [vmem:[%s894_s1 + $0x78] sm:$0xff]   ;;  %v662_v4 = vld [vmem:[%s894_s1 + $0x70] sm:$0xff]   ;;  %v666_v8 = vld [vmem:[%s894_s1 + $0x68] sm:$0xff]  }
   0x2   :  { %v659_v1 = vld [vmem:[%s894_s1 + $0x38] sm:$0xff]   ;;  %592 = vmatprep.subr.bf16.mxu0 %v658_v0  ;;  %v663_v5 = vld [vmem:[%s894_s1 + $0x30] sm:$0xff]   ;;  %v667_v9 = vld [vmem:[%s894_s1 + $0x28] sm:$0xff]  }
   0x3   :  { %v660_v2 = vld [vmem:[%s894_s1 + $0xf8] sm:$0xff]   ;;  %593 = vmatpush3.bf16.msra.mxu0 %v659_v1  ;;  %v664_v6 = vld [vmem:[%s894_s1 + $0xf0] sm:$0xff]   ;;  %v668_v10 = vld [vmem:[%s894_s1 + $0xe8] sm:$0xff]  }
   0x4   :  { %v661_v3 = vld [vmem:[%s894_s1 + $0xb8] sm:$0xff]   ;;  %614 = vmatprep.subr.bf16.mxu1 %v660_v2  ;;  %594 = vmatprep.subr.bf16.mxu0 %v662_v4  ;;  %v665_v7 = vld [vmem:[%s894_s1 + $0xb0] sm:$0xff]   ;;  %v669_v11 = vld [vmem:[%s894_s1 + $0xa8] sm:$0xff]  }
   0x5   :  { %615 = vmatpush3.bf16.msra.mxu1 %v661_v3  ;;  %v670_v12 = vld [vmem:[%s894_s1 + $0x60] sm:$0xff]   ;;  %v674_v16 = vld [vmem:[%s894_s1 + $0x58] sm:$0xff]   ;;  %v678_v20 = vld [vmem:[%s894_s1 + $0x50] sm:$0xff]  }
   0x6   :  { %616 = vmatprep.subr.bf16.mxu1 %v664_v6  ;;  %v671_v13 = vld [vmem:[%s894_s1 + $0x20] sm:$0xff]   ;;  %v675_v17 = vld [vmem:[%s894_s1 + $0x18] sm:$0xff]   ;;  %v679_v21 = vld [vmem:[%s894_s1 + $0x10] sm:$0xff]  }
   0x7   :  { %595 = vmatpush3.bf16.msra.mxu0 %v663_v5  ;;  %v672_v14 = vld [vmem:[%s894_s1 + $0xe0] sm:$0xff]   ;;  %v676_v18 = vld [vmem:[%s894_s1 + $0xd8] sm:$0xff]   ;;  %v680_v22 = vld [vmem:[%s894_s1 + $0xd0] sm:$0xff]  }
   0x8   :  { %596 = vmatprep.subr.bf16.mxu0 %v666_v8  ;;  %v673_v15 = vld [vmem:[%s894_s1 + $0xa0] sm:$0xff]   ;;  %v677_v19 = vld [vmem:[%s894_s1 + $0x98] sm:$0xff]   ;;  %v681_v23 = vld [vmem:[%s894_s1 + $0x90] sm:$0xff]  }
   0x9   :  { %617 = vmatpush3.bf16.msra.mxu1 %v665_v7  ;;  %v682_v24 = vld [vmem:[%s894_s1 + $0x48] sm:$0xff]   ;;  %v686_v28 = vld [vmem:[%s894_s1 + $0x40] sm:$0xff]   ;;  %v690_v36 = vld [vmem:[%s894_s1 + $0x178] sm:$0xff]  }
   0xa   :  { %618 = vmatprep.subr.bf16.mxu1 %v668_v10  ;;  %v683_v25 = vld [vmem:[%s894_s1 + $0x8] sm:$0xff]   ;;  %v687_v29 = vld [vmem:[%s894_s1] sm:$0xff]   ;;  %v18_v37 = vld [vmem:[%s895_s0 + $0x18] sm:$0xff] }
   0xb   :  { %597 = vmatpush3.bf16.msra.mxu0 %v667_v9  ;;  %v684_v26 = vld [vmem:[%s894_s1 + $0xc8] sm:$0xff]   ;;  %v688_v30 = vld [vmem:[%s894_s1 + $0xc0] sm:$0xff]   ;;  %v24_v38 = vpack.c.bf16 %v18_v37, %v18_v37  ;;  %v691_v39 = vld [vmem:[%s894_s1 + $0x138] sm:$0xff]  }
   0xc   :  { %598 = vmatprep.subr.bf16.mxu0 %v670_v12  ;;  %v685_v27 = vld [vmem:[%s894_s1 + $0x88] sm:$0xff]   ;;  %v689_v33 = vld [vmem:[%s894_s1 + $0x80] sm:$0xff]   ;;  %v17_v40 = vld [vmem:[%s895_s0 + $0x10] sm:$0xff] }
   0xd   :  { %619 = vmatpush3.bf16.msra.mxu1 %v669_v11  ;;  %v16_v31 = vld [vmem:[%s895_s0 + $0x8] sm:$0xff]  ;;  %v15_v34 = vld [vmem:[%s895_s0] sm:$0xff]  ;;  %490 = vmatprep.mubr.bf16.mxu1 %v24_v38  ;;  %v23_v41 = vpack.c.bf16 %v17_v40, %v17_v40  ;;  %v692_v42 = vld [vmem:[%s894_s1 + $0x170] sm:$0xff]  }
   0xe   :  { %620 = vmatprep.subr.bf16.mxu1 %v672_v14  ;;  %v22_v32 = vpack.c.bf16 %v16_v31, %v16_v31  ;;  %v21_v35 = vpack.c.bf16 %v15_v34, %v15_v34  ;;  %v693_v43 = vld [vmem:[%s894_s1 + $0x130] sm:$0xff]   ;;  %v694_v44 = vld [vmem:[%s894_s1 + $0x168] sm:$0xff]   ;;  %v696_v46 = vld [vmem:[%s894_s1 + $0x160] sm:$0xff]  }
   0xf   :  { %599 = vmatpush3.bf16.msra.mxu0 %v671_v13  ;;  %v695_v45 = vld [vmem:[%s894_s1 + $0x128] sm:$0xff]   ;;  %v697_v47 = vld [vmem:[%s894_s1 + $0x120] sm:$0xff]   ;;  %v698_v48 = vld [vmem:[%s894_s1 + $0x158] sm:$0xff]  }
  0x10   :  { %600 = vmatprep.subr.bf16.mxu0 %v674_v16  ;;  %450 = vmatprep.mubr.bf16.mxu0 %v22_v32  ;;  %v699_v49 = vld [vmem:[%s894_s1 + $0x118] sm:$0xff]   ;;  %v700_v50 = vld [vmem:[%s894_s1 + $0x150] sm:$0xff]   ;;  %v20_v51 = vld [vmem:[%s895_s0 + $0x28] sm:$0xff] }
  0x11   :  { %621 = vmatpush3.bf16.msra.mxu1 %v673_v15  ;;  %v26_v52 = vpack.c.bf16 %v20_v51, %v20_v51  ;;  %v701_v53 = vld [vmem:[%s894_s1 + $0x110] sm:$0xff]   ;;  %v702_v54 = vld [vmem:[%s894_s1 + $0x148] sm:$0xff]   ;;  %v704_v56 = vld [vmem:[%s894_s1 + $0x140] sm:$0xff]  }
  0x12   :  { %622 = vmatprep.subr.bf16.mxu1 %v676_v18  ;;  %v703_v55 = vld [vmem:[%s894_s1 + $0x108] sm:$0xff]   ;;  %v705_v57 = vld [vmem:[%s894_s1 + $0x100] sm:$0xff]  }
  0x13   :  { %601 = vmatpush3.bf16.msra.mxu0 %v675_v17  ;;  %v19_v58 = vld [vmem:[%s895_s0 + $0x20] sm:$0xff] }
  0x14   :  { %602 = vmatprep.subr.bf16.mxu0 %v678_v20  ;;  %v25_v59 = vpack.c.bf16 %v19_v58, %v19_v58  ;;  %v543_v5 = vld [vmem:[%s896_s2] ss:$0 sm:$0xff] }
  0x15   :  { %623 = vmatpush3.bf16.msra.mxu1 %v677_v19 }
  0x16   :  { %624 = vmatprep.subr.bf16.mxu1 %v680_v22 }
  0x17   :  { %603 = vmatpush3.bf16.msra.mxu0 %v679_v21 }
  0x18   :  { %604 = vmatprep.subr.bf16.mxu0 %v682_v24 }
  0x19   :  { %625 = vmatpush3.bf16.msra.mxu1 %v681_v23 }
  0x1a   :  { %626 = vmatprep.subr.bf16.mxu1 %v684_v26 }
  0x1b   :  { %605 = vmatpush3.bf16.msra.mxu0 %v683_v25 }
  0x1c   :  { %606 = vmatprep.subr.bf16.mxu0 %v686_v28 }
  0x1d   :  { %627 = vmatpush3.bf16.msra.mxu1 %v685_v27 }
  0x1e   :  { %628 = vmatprep.subr.bf16.mxu1 %v688_v30 }
  0x1f   :  { %607 = vmatpush3.bf16.msra.mxu0 %v687_v29 }
  0x20   :  { %636 = vmatprep.subr.bf16.mxu0 %v690_v36 }
  0x21   :  { %629 = vmatpush3.bf16.msra.mxu1 %v689_v33 }
  0x22   :  { %451 = vmatmul.mubr.bf16.vlgmr.msra.gmra.mxu0 %v21_v35 }
  0x23   :  { %637 = vmatpush3.bf16.msra.mxu0 %v691_v39  ;;  %530 = vmatprep.mubr.bf16.mxu0 %v26_v52 }
  0x24   :  { %491 = vmatmul.mubr.bf16.vlgmr.msra.gmra.mxu1 %v23_v41  ;;  %638 = vmatprep.subr.bf16.mxu0 %v692_v42 }
  0x27   :  { %639 = vmatpush3.bf16.msra.mxu0 %v693_v43 }
  0x28   :  { %640 = vmatprep.subr.bf16.mxu0 %v694_v44 }
  0x2b   :  { %641 = vmatpush3.bf16.msra.mxu0 %v695_v45 }
  0x2c   :  { %642 = vmatprep.subr.bf16.mxu0 %v696_v46 }
  0x2f   :  { %643 = vmatpush3.bf16.msra.mxu0 %v697_v47 }
  0x30   :  { %644 = vmatprep.subr.bf16.mxu0 %v698_v48 }
  0x33   :  { %645 = vmatpush3.bf16.msra.mxu0 %v699_v49 }
  0x34   :  { %646 = vmatprep.subr.bf16.mxu0 %v700_v50 }
  0x37   :  { %647 = vmatpush3.bf16.msra.mxu0 %v701_v53 }
  0x38   :  { %648 = vmatprep.subr.bf16.mxu0 %v702_v54 }
  0x3b   :  { %649 = vmatpush3.bf16.msra.mxu0 %v703_v55 }
  0x3c   :  { %650 = vmatprep.subr.bf16.mxu0 %v704_v56 }
  0x3f   :  { %651 = vmatpush3.bf16.msra.mxu0 %v705_v57 }
  0x42   :  { %531 = vmatmul.mubr.bf16.vlgmr.msra.gmra.mxu0 %v25_v59 }
  0xe2   :  { %v608_v60 = vpop.f32.mrf.mxu0 }
  0xe4   :  { %v609_v61 = vpop.f32.mrf.mxu0  ;;  %v630_v62 = vpop.f32.mrf.mxu1 }
  0xe5   :  { %v610_v4 = vadd.f32 %v609_v61, %v608_v60 }
  0xe6   :  { %v611_v63 = vpop.f32.mrf.mxu0  ;;  %v631_v0 = vpop.f32.mrf.mxu1 }
  0xe7   :  { %v453_v6 = vadd.f32 %v610_v4, %v543_v5  ;;  %v632_v7 = vadd.f32 %v631_v0, %v630_v62 }
  0xe8   :  { %v612_v1 = vpop.f32.mrf.mxu0  ;;  %v633_v2 = vpop.f32.mrf.mxu1 }
  0xe9   :  { %v493_v10 = vadd.f32 %v632_v7, %v453_v6 }
  0xea   :  { %v634_v3 = vpop.f32.mrf.mxu1 }
 0x102   :  { %v652_v8 = vpop.f32.mrf.mxu0 }
 0x104   :  { %v653_v9 = vpop.f32.mrf.mxu0 }
 0x105   :  { %v654_v11 = vadd.f32 %v653_v9, %v652_v8 }
 0x106   :  { %v655_v12 = vpop.f32.mrf.mxu0 }
 0x107   :  { %v533_v13 = vadd.f32 %v654_v11, %v493_v10 }
 0x108   :  { %v656_v14 = vpop.f32.mrf.mxu0 }
 0x109   :  { %538 = vst [vmem:[%s897_s3] sm:$0xff] %v533_v13 }

// kernel: vilt_meme_sentiment_forward.11
= control target key start
LH: loop header
LB: loop body
LE: loop exit
PB: predicated region body
PF: predicated region fallthrough
CT: control target
= control target key end

     0   :  { %s107_s0 = inlined_call_operand.vmem [shape: f32[16,128], index: 0, kind: input, shape index: {}]   ;;  %s108_s1 = inlined_call_operand.vmem [shape: f32[1,128], index: 1, kind: input, shape index: {}]   ;;  %s109_s2 = inlined_call_operand.vmem [shape: f32[1,128], index: 2, kind: input, shape index: {}]   ;;  %s110_s3 = inlined_call_operand.vmem [shape: f32[16,128], index: 3, kind: output, shape index: {}]  }
   0x1   :  { %v14_v0 = vld [vmem:[%s107_s0] sm:$0xff]  ;;  %v15_v1 = vld [vmem:[%s107_s0 + $0x8] sm:$0xff] }
   0x2   :  { %16 = vadd.xlane.f32.xlu0 %v14_v0  ;;  %v63_v17 = vld [vmem:[%s108_s1] ss:$0 sm:$0xff] }
   0x3   :  { %v64_v19 = vld [vmem:[%s109_s2] ss:$0 sm:$0xff] }
   0x6   :  { %18 = vadd.xlane.f32.xlu0 %v15_v1 }
  0x8b   :  { %v17_v2 = vpop.xlane.xlu0 %16 }
  0x8c   :  { %v21_v3 = vmul.f32 0.0078125, %v17_v2 }
  0x8e   :  { %v23_v4 = vsub.f32 %v14_v0, %v21_v3 }
  0x8f   :  { %v19_v5 = vpop.xlane.xlu0 %18 }
  0x90   :  { %v22_v6 = vmul.f32 0.0078125, %v19_v5  ;;  %v25_v7 = vmul.f32 %v23_v4, %v23_v4 }
  0x92   :  { %v24_v8 = vsub.f32 %v15_v1, %v22_v6  ;;  %27 = vadd.xlane.f32.xlu1 %v25_v7 }
  0x94   :  { %v26_v9 = vmul.f32 %v24_v8, %v24_v8 }
  0x96   :  { %29 = vadd.xlane.f32.xlu1 %v26_v9 }
 0x11b   :  { %v28_v10 = vpop.xlane.xlu1 %27 }
 0x11c   :  { %v31_v11 = vmul.f32 0.0078125, %v28_v10 }
 0x11e   :  { %v33_v12 = vadd.f32 1e-12, %v31_v11 }
 0x11f   :  { %v30_v13 = vpop.xlane.xlu1 %29 }
 0x120   :  { %65 = vrsqrt.f32 %v33_v12  ;;  %v32_v14 = vmul.f32 0.0078125, %v30_v13 }
 0x122   :  { %v34_v15 = vadd.f32 1e-12, %v32_v14 }
 0x124   :  { %67 = vrsqrt.f32 %v34_v15 }
 0x12d   :  { %v66_v16 = vpop.eup %65 }
 0x12e   :  { %v37_v18 = vmul.f32 %v66_v16, %v23_v4 }
 0x130   :  { %v46_v20 = vmul.f32 %v63_v17, %v37_v18 }
 0x131   :  { %v68_v21 = vpop.eup %67 }
 0x132   :  { %v55_v22 = vadd.f32 %v64_v19, %v46_v20  ;;  %v38_v23 = vmul.f32 %v68_v21, %v24_v8 }
 0x134   :  { %57 = vst [vmem:[%s110_s3] sm:$0xff] %v55_v22  ;;  %v47_v24 = vmul.f32 %v63_v17, %v38_v23 }
 0x136   :  { %v56_v25 = vadd.f32 %v64_v19, %v47_v24 }
 0x138   :  { %58 = vst [vmem:[%s110_s3 + $0x8] sm:$0xff] %v56_v25 }

// kernel: vilt_meme_sentiment_forward.13
= control target key start
LH: loop header
LB: loop body
LE: loop exit
PB: predicated region body
PF: predicated region fallthrough
CT: control target
= control target key end

     0   :  { %v612_v45 = vmov 0   ;;  %s774_s0 = inlined_call_operand.vmem [shape: bf16[32,128], index: 0, kind: input, shape index: {}]   ;;  %s775_s1 = inlined_call_operand.vmem [shape: bf16[128,384], index: 1, kind: input, shape index: {}]   ;;  %s776_s3 = inlined_call_operand.vmem [shape: f32[1,128], index: 3, kind: input, shape index: {}]   ;;  %s777_s4 = inlined_call_operand.vmem [shape: f32[1,128], index: 4, kind: input, shape index: {}]   ;;  %s778_s2 = inlined_call_operand.vmem [shape: f32[1,384], index: 2, kind: input, shape index: {}]   ;;  %s779_s5 = inlined_call_operand.vmem [shape: bf16[32,384], index: 5, kind: output, shape index: {}]  }
   0x1   :  { %v520_v0 = vld [vmem:[%s774_s0] sm:$0xff]   ;;  %v537_v1 = vld [vmem:[%s774_s0 + $0x8] sm:$0xff]   ;;  %v575_v25 = vld [vmem:[%s775_s1 + $0xb0] ss:$12 sps:$4 sm:$0xff]   ;;  %345 = vmatprep.mubr.bf16.mxu0 %v612_v45 }
   0x2   :  { %v521_v2 = vunpack.c.l.bf16 %v520_v0  ;;  %v525_v3 = vunpack.c.l.bf16 %v537_v1  ;;  %v522_v4 = vunpack.c.h.bf16 %v520_v0  ;;  %v526_v5 = vunpack.c.h.bf16 %v537_v1  ;;  %v570_v22 = vld [vmem:[%s775_s1 + $0xac] ss:$12 sps:$4 sm:$0xff]   ;;  %v572_v23 = vld [vmem:[%s775_s1 + $0xa8] ss:$12 sps:$4 sm:$0xff]   ;;  %v576_v26 = vld [vmem:[%s775_s1 + $0x90] ss:$12 sps:$4 sm:$0xff]   ;;  %549 = vmatprep.subr.bf16.mxu1 %v575_v25 }
   0x3   :  { %313 = vmatprep.subr.bf16.mxu0 %v570_v22  ;;  %v573_v24 = vld [vmem:[%s775_s1 + $0x94] ss:$12 sps:$4 sm:$0xff]   ;;  %550 = vmatpush3.bf16.msra.mxu1 %v575_v25  ;;  %v577_v27 = vld [vmem:[%s775_s1 + $0x7c] ss:$12 sps:$4 sm:$0xff]   ;;  %v579_v28 = vld [vmem:[%s775_s1 + $0x98] ss:$12 sps:$4 sm:$0xff]  }
   0x4   :  { %33 = vadd.xlane.f32.xlu0 %v521_v2  ;;  %37 = vadd.xlane.f32.xlu1 %v525_v3  ;;  %v580_v29 = vld [vmem:[%s775_s1 + $0x78] ss:$12 sps:$4 sm:$0xff]   ;;  %v583_v31 = vld [vmem:[%s775_s1 + $0x80] ss:$12 sps:$4 sm:$0xff]   ;;  %v587_v34 = vld [vmem:[%s775_s1 + $0x68] ss:$12 sps:$4 sm:$0xff]  }
   0x5   :  { %314 = vmatpush1.bf16.msra.mxu0 %v572_v23  ;;  %551 = vmatprep.subr.bf16.mxu1 %v579_v28  ;;  %v581_v30 = vld [vmem:[%s775_s1 + $0x64] ss:$12 sps:$4 sm:$0xff]   ;;  %v584_v32 = vld [vmem:[%s775_s1 + $0x60] ss:$12 sps:$4 sm:$0xff]   ;;  %v588_v35 = vld [vmem:[%s775_s1 + $0x48] ss:$12 sps:$4 sm:$0xff]  }
   0x6   :  { %315 = vmatprep.subr.bf16.mxu0 %v573_v24  ;;  %v585_v33 = vld [vmem:[%s775_s1 + $0x4c] ss:$12 sps:$4 sm:$0xff]   ;;  %v589_v36 = vld [vmem:[%s775_s1 + $0x34] ss:$12 sps:$4 sm:$0xff]   ;;  %v591_v37 = vld [vmem:[%s775_s1 + $0x50] ss:$12 sps:$4 sm:$0xff]  }
   0x7   :  { %552 = vmatpush3.bf16.msra.mxu1 %v579_v28  ;;  %v592_v38 = vld [vmem:[%s775_s1 + $0x30] ss:$12 sps:$4 sm:$0xff]   ;;  %v595_v40 = vld [vmem:[%s775_s1 + $0x38] ss:$12 sps:$4 sm:$0xff]   ;;  %v599_v43 = vld [vmem:[%s775_s1 + $0x20] ss:$12 sps:$4 sm:$0xff]  }
   0x8   :  { %35 = vadd.xlane.f32.xlu0 %v522_v4  ;;  %39 = vadd.xlane.f32.xlu1 %v526_v5  ;;  %v593_v39 = vld [vmem:[%s775_s1 + $0x1c] ss:$12 sps:$4 sm:$0xff]   ;;  %v596_v41 = vld [vmem:[%s775_s1 + $0x18] ss:$12 sps:$4 sm:$0xff]   ;;  %v600_v44 = vld [vmem:[%s775_s1] ss:$12 sps:$4 sm:$0xff]  }
   0x9   :  { %316 = vmatpush1.bf16.msra.mxu0 %v576_v26  ;;  %553 = vmatprep.subr.bf16.mxu1 %v583_v31  ;;  %v597_v42 = vld [vmem:[%s775_s1 + $0x4] ss:$12 sps:$4 sm:$0xff]   ;;  %v602_v46 = vld [vmem:[%s775_s1 + $0x8] ss:$12 sps:$4 sm:$0xff]   ;;  %v467_v61 = vld [vmem:[%s776_s3] ss:$0 sm:$0xff] }
   0xa   :  { %317 = vmatprep.subr.bf16.mxu0 %v577_v27 }
   0xb   :  { %554 = vmatpush3.bf16.msra.mxu1 %v583_v31 }
   0xc   :  { %555 = vmatprep.subr.bf16.mxu1 %v587_v34 }
   0xd   :  { %318 = vmatpush1.bf16.msra.mxu0 %v580_v29 }
   0xe   :  { %319 = vmatprep.subr.bf16.mxu0 %v581_v30 }
   0xf   :  { %556 = vmatpush3.bf16.msra.mxu1 %v587_v34 }
  0x10   :  { %557 = vmatprep.subr.bf16.mxu1 %v591_v37 }
  0x11   :  { %320 = vmatpush1.bf16.msra.mxu0 %v584_v32 }
  0x12   :  { %321 = vmatprep.subr.bf16.mxu0 %v585_v33 }
  0x13   :  { %558 = vmatpush3.bf16.msra.mxu1 %v591_v37 }
  0x14   :  { %559 = vmatprep.subr.bf16.mxu1 %v595_v40 }
  0x15   :  { %322 = vmatpush1.bf16.msra.mxu0 %v588_v35 }
  0x16   :  { %323 = vmatprep.subr.bf16.mxu0 %v589_v36 }
  0x17   :  { %560 = vmatpush3.bf16.msra.mxu1 %v595_v40 }
  0x18   :  { %561 = vmatprep.subr.bf16.mxu1 %v599_v43 }
  0x19   :  { %324 = vmatpush1.bf16.msra.mxu0 %v592_v38 }
  0x1a   :  { %325 = vmatprep.subr.bf16.mxu0 %v593_v39 }
  0x1b   :  { %562 = vmatpush3.bf16.msra.mxu1 %v599_v43 }
  0x1c   :  { %563 = vmatprep.subr.bf16.mxu1 %v602_v46 }
  0x1d   :  { %326 = vmatpush1.bf16.msra.mxu0 %v596_v41 }
  0x1e   :  { %327 = vmatprep.subr.bf16.mxu0 %v597_v42 }
  0x1f   :  { %564 = vmatpush3.bf16.msra.mxu1 %v602_v46 }
  0x21   :  { %328 = vmatpush1.bf16.msra.mxu0 %v600_v44 }
  0x8d   :  { %v34_v6 = vpop.xlane.xlu0 %33  ;;  %v38_v7 = vpop.xlane.xlu1 %37 }
  0x8e   :  { %v42_v8 = vmul.f32 0.0078125, %v34_v6  ;;  %v44_v9 = vmul.f32 0.0078125, %v38_v7 }
  0x90   :  { %v649_v10 = vsub.f32 %v521_v2, %v42_v8  ;;  %v651_v11 = vsub.f32 %v525_v3, %v44_v9  ;;  %v468_v2 = vld [vmem:[%s777_s4] ss:$0 sm:$0xff] }
  0x91   :  { %v36_v12 = vpop.xlane.xlu0 %35  ;;  %v40_v13 = vpop.xlane.xlu1 %39 }
  0x92   :  { %v43_v14 = vmul.f32 0.0078125, %v36_v12  ;;  %v50_v15 = vmul.f32 %v649_v10, %v649_v10  ;;  %v45_v16 = vmul.f32 0.0078125, %v40_v13  ;;  %v52_v19 = vmul.f32 %v651_v11, %v651_v11 }
  0x94   :  { %v655_v17 = vsub.f32 %v522_v4, %v43_v14  ;;  %54 = vadd.xlane.f32.xlu0 %v50_v15  ;;  %v657_v18 = vsub.f32 %v526_v5, %v45_v16 }
  0x96   :  { %v51_v20 = vmul.f32 %v655_v17, %v655_v17  ;;  %v53_v21 = vmul.f32 %v657_v18, %v657_v18 }
  0x98   :  { %58 = vadd.xlane.f32.xlu0 %v52_v19  ;;  %56 = vadd.xlane.f32.xlu1 %v51_v20 }
  0x9c   :  { %60 = vadd.xlane.f32.xlu1 %v53_v21 }
 0x11d   :  { %v55_v47 = vpop.xlane.xlu0 %54 }
 0x11e   :  { %v62_v48 = vmul.f32 0.0078125, %v55_v47 }
 0x120   :  { %v66_v49 = vadd.f32 1e-12, %v62_v48 }
 0x121   :  { %v57_v50 = vpop.xlane.xlu1 %56  ;;  %v59_v51 = vpop.xlane.xlu0 %58 }
 0x122   :  { %604 = vrsqrt.f32 %v66_v49  ;;  %v63_v52 = vmul.f32 0.0078125, %v57_v50  ;;  %v64_v53 = vmul.f32 0.0078125, %v59_v51 }
 0x124   :  { %v67_v54 = vadd.f32 1e-12, %v63_v52  ;;  %v68_v55 = vadd.f32 1e-12, %v64_v53 }
 0x125   :  { %v61_v56 = vpop.xlane.xlu1 %60 }
 0x126   :  { %606 = vrsqrt.f32 %v67_v54  ;;  %v65_v57 = vmul.f32 0.0078125, %v61_v56 }
 0x127   :  { %608 = vrsqrt.f32 %v68_v55 }
 0x128   :  { %v69_v58 = vadd.f32 1e-12, %v65_v57 }
 0x12a   :  { %610 = vrsqrt.f32 %v69_v58 }
 0x12f   :  { %v605_v59 = vpop.eup %604 }
 0x130   :  { %v74_v60 = vmul.f32 %v605_v59, %v649_v10 }
 0x132   :  { %v85_v0 = vmul.f32 %v467_v61, %v74_v60 }
 0x133   :  { %v607_v62 = vpop.eup %606 }
 0x134   :  { %v609_v63 = vpop.eup %608  ;;  %v75_v1 = vmul.f32 %v607_v62, %v655_v17  ;;  %v96_v6 = vadd.f32 %v468_v2, %v85_v0 }
 0x135   :  { %v76_v3 = vmul.f32 %v609_v63, %v651_v11  ;;  %v158_v11 = vlaneseq }
 0x136   :  { %v86_v4 = vmul.f32 %v467_v61, %v75_v1 }
 0x137   :  { %v611_v5 = vpop.eup %610  ;;  %v87_v8 = vmul.f32 %v467_v61, %v76_v3  ;;  %v159_v19 = vshrl.u32 %v158_v11, 7 }
 0x138   :  { %v97_v7 = vadd.f32 %v468_v2, %v86_v4  ;;  %v77_v9 = vmul.f32 %v611_v5, %v657_v18  ;;  %v156_v18 = vld [vmem:[%s778_s2] sm:$0x7] }
 0x139   :  { %v98_v13 = vadd.f32 %v468_v2, %v87_v8  ;;  %v160_v20 = vsub.s32 0, %v159_v19  ;;  %v164_v21 = vsub.s32 1, %v159_v19  ;;  %v168_v22 = vsub.s32 2, %v159_v19 }
 0x13a   :  { %v530_v10 = vpack.c.bf16 %v97_v7, %v96_v6  ;;  %v88_v12 = vmul.f32 %v467_v61, %v77_v9 }
 0x13b   :  { %v161_v23 = vrot.slane %v156_v18, %v160_v20  ;;  %v165_v24 = vrot.slane %v156_v18, %v164_v21  ;;  %v169_v26 = vrot.slane %v156_v18, %v168_v22 }
 0x13c   :  { %531 = vst [vmem:[#allocation2] sm:$0xff] %v530_v10   ;;  %v99_v14 = vadd.f32 %v468_v2, %v88_v12 }
 0x13e   :  { %v535_v15 = vpack.c.bf16 %v99_v14, %v98_v13 }
 0x140   :  { %538 = vst [vmem:[#allocation2 + $0x8] sm:$0xff] %v535_v15  }
 0x143   :  { %v601_v16 = vld [vmem:[#allocation2] sm:$0xff]  }
 0x144   :  { %346 = vmatmul.mubr.bf16.vlgmr.msra.gmra.mxu0 %v601_v16  ;;  %565 = vmatprep.mubr.bf16.mxu1 %v601_v16 }
 0x145   :  { %355 = vmatprep.mubr.bf16.mxu0 %v612_v45 }
 0x147   :  { %v603_v17 = vld [vmem:[#allocation2 + $0x8] sm:$0xff]  }
 0x148   :  { %566 = vmatmul.mubr.bf16.vlgmr.msra.gmra.mxu1 %v603_v17 }
 0x14c   :  { %356 = vmatmul.mubr.bf16.gmra.mxu0 %v603_v17 }
 0x204   :  { %v347_v25 = vpop.f32.mrf.mxu0 }
 0x205   :  { %v348_v28 = vadd.f32 %v347_v25, %v161_v23 }
 0x206   :  { %v349_v27 = vpop.f32.mrf.mxu0 }
 0x207   :  { %v350_v29 = vadd.f32 %v349_v27, %v165_v24 }
 0x208   :  { %v351_v30 = vpop.f32.mrf.mxu0  ;;  %v567_v31 = vpop.f32.mrf.mxu1 }
 0x209   :  { %v511_v32 = vpack.c.bf16 %v350_v29, %v348_v28  ;;  %v409_v33 = vadd.f32 %v567_v31, %v169_v26  ;;  %v352_v36 = vadd.f32 %v351_v30, %v161_v23 }
 0x20a   :  { %v353_v34 = vpop.f32.mrf.mxu0  ;;  %v400_v35 = vpop.f32.mrf.mxu1 }
 0x20b   :  { %455 = vst [vmem:[%s779_s5] sm:$0xff] %v511_v32  ;;  %v516_v37 = vpack.c.bf16 %v409_v33, %v409_v33  ;;  %v354_v38 = vadd.f32 %v353_v34, %v165_v24  ;;  %v401_v39 = vadd.f32 %v400_v35, %v169_v26 }
 0x20c   :  { %v357_v40 = vpop.f32.mrf.mxu0  ;;  %v568_v41 = vpop.f32.mrf.mxu1 }
 0x20d   :  { %460 = vst [vmem:[%s779_s5 + $0x20] sm:$0xf] %v516_v37  ;;  %v513_v42 = vpack.c.bf16 %v354_v38, %v352_v36  ;;  %v512_v43 = vpack.c.bf16 %v401_v39, %v401_v39  ;;  %v412_v44 = vadd.f32 %v568_v41, %v169_v26  ;;  %v358_v47 = vadd.f32 %v357_v40, %v161_v23 }
 0x20e   :  { %v359_v45 = vpop.f32.mrf.mxu0  ;;  %v403_v46 = vpop.f32.mrf.mxu1 }
 0x20f   :  { %457 = vst [vmem:[%s779_s5 + $0xc] sm:$0xff] %v513_v42  ;;  %456 = vst [vmem:[%s779_s5 + $0x8] sm:$0xf] %v512_v43  ;;  %v518_v48 = vpack.c.bf16 %v412_v44, %v412_v44  ;;  %v360_v49 = vadd.f32 %v359_v45, %v165_v24  ;;  %v404_v50 = vadd.f32 %v403_v46, %v169_v26 }
 0x210   :  { %v361_v51 = vpop.f32.mrf.mxu0 }
 0x211   :  { %462 = vst [vmem:[%s779_s5 + $0x2c] sm:$0xf] %v518_v48  ;;  %v515_v52 = vpack.c.bf16 %v360_v49, %v358_v47  ;;  %v514_v53 = vpack.c.bf16 %v404_v50, %v404_v50  ;;  %v362_v55 = vadd.f32 %v361_v51, %v161_v23 }
 0x212   :  { %v363_v54 = vpop.f32.mrf.mxu0 }
 0x213   :  { %459 = vst [vmem:[%s779_s5 + $0x18] sm:$0xff] %v515_v52  ;;  %458 = vst [vmem:[%s779_s5 + $0x14] sm:$0xf] %v514_v53  ;;  %v364_v56 = vadd.f32 %v363_v54, %v165_v24 }
 0x215   :  { %v517_v57 = vpack.c.bf16 %v364_v56, %v362_v55 }
 0x217   :  { %461 = vst [vmem:[%s779_s5 + $0x24] sm:$0xff] %v517_v57 }

// kernel: vilt_meme_sentiment_forward.14
= control target key start
LH: loop header
LB: loop body
LE: loop exit
PB: predicated region body
PF: predicated region fallthrough
CT: control target
= control target key end

     0   :  { %s961_s9 = smov 0   ;;  %s1082_s0 = inlined_call_operand.vmem [shape: bf16[2,16,384], index: 0, kind: input, shape index: {}]   ;;  %s1083_s1 = inlined_call_operand.vmem [shape: f32[2,1,16], index: 1, kind: input, shape index: {}]   ;;  %s1084_s2 = inlined_call_operand.vmem [shape: bf16[2,16,128], index: 2, kind: output, shape index: {}]  }
   0x1 LB: > { %s773_s10 = sadd.s32 4294967295, %s939_s9   ;;  %p777_p0 = scmp.ge.s32.totalorder %s939_s9, 1  ;;  %s939_s9 = sphi %s961_s9, %s12_s9  }
   0x2   : > { %p120_p1 = scmp.lt.s32.totalorder %s939_s9, 3 }
   0x4   : > { %p121_p2 = pnand %p777_p0, %p120_p1 }
   0x5   : > { %p145_p3 = scmp.lt.s32.totalorder (!%p121_p2), %s773_s10, 1  ;;  %s943_s15 = smov (!%p121_p2), 96  }
   0x6   : > { %124 = sbr.rel (%p121_p2) target bundleno = 1131 (0x46b), region = 28  ;;  %s944_s16 = smov (!%p121_p2), 64  }
   0x7   : > { %s945_s17 = smov (!%p121_p2), 32  }
   0xb   : > { %v941_v0 = vmov 0.0   ;;  %vm942_vm0 = vmmov 0   ;;  %s1086_s10 = smov (!%p145_p3, %s773_s10), 1  ;;  %vm182_vm1 = vcmask 261120   ;;  %vm230_vm2 = vcmask 130048  }
   0xc   : > { %821 = vmatprep.subr.bf16.mxu0 %v941_v0  ;;  %823 = vmatprep.mubr.msk.bf16.mxu0 %vm942_vm0, %v941_v0  ;;  %s869_s11 = smul.u32 24, %s1086_s10  ;;  %s152_s20 = scalar_lea.vmem %s1083_s1, %s1086_s10  ;;  %vm693_vm3 = vcmask 523264   ;;  %vm696_vm4 = vcmask 785408  }
   0xd   : > { %827 = vmatprep.subr.bf16.mxu1 %v941_v0  ;;  %829 = vmatprep.mubr.msk.bf16.mxu1 %vm942_vm0, %v941_v0  ;;  %v995_v4 = vld [vmem:[%s152_s20] ss:$0 sm:$0xff]  ;;  %s797_s21 = sshll.u32 %s1086_s10, 3 }
   0xe   : > { %s149_s14 = scalar_lea.vmem %s1082_s0, %s869_s11  ;;  %s157_s24 = scalar_lea.vmem %s1084_s2, %s797_s21 }
   0xf   : > { %v898_v1 = vld [vmem:[%s149_s14 + $0x4] ss:$12 sps:$4 sm:$0xff]   ;;  %v899_v3 = vld [vmem:[%s149_s14] ss:$12 sps:$4 sm:$0xff]   ;;  %v1001_v13 = vld [vmem:[%s149_s14 + $0x8] ss:$12 sps:$4 sm:$0xff]  }
  0x10   : > { %v187_v2 = vsel %vm182_vm1, %v898_v1, 0  ;;  %306 = vrot.lane.b32.xlu1 %v898_v1, %s943_s15  ;;  %828 = vmatpush3.bf16.msra.mxu1 %v1001_v13 }
  0x11   : > { %822 = vmatpush3.bf16.xpose.msra.mxu0 %v187_v2  ;;  %833 = vmatprep.subr.bf16.mxu1 %v941_v0 }
  0x12   : > { %839 = vmatprep.subr.bf16.mxu0 %v941_v0 }
  0x14   : > { %304 = vrot.lane.b32.xlu1 %v899_v3, %s943_s15 }
  0x18   : > { %824 = vmatmul.mubr.msk.bf16.vlgmr.msra.gmra.mxu0 %vm182_vm1, %v899_v3  ;;  %425 = vrot.lane.b32.xlu1 %v899_v3, %s944_s16 }
  0x19   : > { %841 = vmatprep.mubr.msk.bf16.mxu0 %vm942_vm0, %v941_v0 }
  0x1c   : > { %548 = vrot.lane.b32.xlu1 %v898_v1, %s945_s17 }
  0x20   : > { %546 = vrot.lane.b32.xlu1 %v899_v3, %s945_s17 }
  0x82   : > { %v307_v20 = vpop.permute.xlu1 %306 }
  0x83   : > { %v312_v23 = vsel %vm182_vm1, %v307_v20, 0 }
  0x86   : > { %v305_v25 = vpop.permute.xlu1 %304 }
  0x8a   : > { %v426_v27 = vpop.permute.xlu1 %425 }
  0x8e   : > { %v549_v29 = vpop.permute.xlu1 %548 }
  0x8f   : > { %v554_v30 = vsel %vm182_vm1, %v549_v29, 0 }
  0x92   : > { %v547_v31 = vpop.permute.xlu1 %546 }
  0xd8   : > { %v223_v5 = vpop.f32.mrf.mxu0 }
  0xd9   : > { %v224_v6 = vadd.f32 %v995_v4, %v223_v5 }
  0xda   : > { %v825_v7 = vpop.f32.mrf.mxu0 }
  0xdb   : > { %v231_v8 = vsel %vm230_vm2, %v224_v6, -inf }
  0xdc   : > { %232 = vmax.xlane.f32.xlu0 %v231_v8  ;;  %v226_v9 = vpop.f32.mrf.mxu0 }
  0xdd   : > { %v227_v10 = vadd.f32 %v995_v4, %v226_v9 }
  0xde   : > { %v826_v11 = vpop.f32.mrf.mxu0 }
  0xdf   : > { %v234_v12 = vsel %vm230_vm2, %v227_v10, -inf }
  0xe0   : > { %235 = vmax.xlane.f32.xlu0 %v234_v12 }
  0xf6   : > { %427 = vrot.lane.b32.xlu0 %v898_v1, %s944_s16 }
 0x165   : > { %v233_v14 = vpop.xlane.xlu0 %232 }
 0x166   : > { %v237_v15 = vsub.f32 %v224_v6, %v233_v14 }
 0x168   : > { %v239_v16 = vmul.f32 1.442695, %v237_v15 }
 0x169   : > { %v236_v17 = vpop.xlane.xlu0 %235 }
 0x16a   : > { %v238_v18 = vsub.f32 %v227_v10, %v236_v17  ;;  %901 = vpow2.f32 %v239_v16 }
 0x16c   : > { %v241_v19 = vmul.f32 1.442695, %v238_v18 }
 0x16d   : > { %v428_v26 = vpop.permute.xlu0 %427 }
 0x16e   : > { %903 = vpow2.f32 %v241_v19  ;;  %v433_v28 = vsel %vm182_vm1, %v428_v26, 0 }
 0x177   : > { %v1006_v21 = vpop.eup %901 }
 0x17b   : > { %v1008_v22 = vpop.eup %903 }
 0x17c   : > { %v249_v24 = vpack.c.bf16 %v1008_v22, %v1006_v21 }
 0x17e   : > { %830 = vmatmul.mubr.msk.bf16.vlgmr.msra.gmra.mxu1 %vm230_vm2, %v249_v24 }
 0x17f   : > { %834 = vmatpush3.bf16.xpose.msra.mxu1 %v312_v23  ;;  %835 = vmatprep.mubr.msk.bf16.mxu1 %vm942_vm0, %v941_v0 }
 0x180   : > { %845 = vmatprep.subr.bf16.mxu1 %v941_v0 }
 0x186   : > { %836 = vmatmul.mubr.msk.bf16.vlgmr.msra.gmra.mxu1 %vm182_vm1, %v305_v25 }
 0x187   : > { %846 = vmatpush3.bf16.xpose.msra.mxu1 %v433_v28  ;;  %847 = vmatprep.mubr.msk.bf16.mxu1 %vm942_vm0, %v941_v0  ;;  %v243_v28 = vsel %vm230_vm2, %v1006_v21, 0.0 }
 0x188   : > { %857 = vmatprep.subr.bf16.mxu1 %v941_v0 }
 0x18e   : > { %848 = vmatmul.mubr.msk.bf16.vlgmr.msra.gmra.mxu1 %vm182_vm1, %v426_v27 }
 0x18f   : > { %858 = vmatpush3.bf16.xpose.msra.mxu1 %v554_v30  ;;  %859 = vmatprep.mubr.msk.bf16.mxu1 %vm942_vm0, %v941_v0 }
 0x196   : > { %860 = vmatmul.mubr.msk.bf16.vlgmr.msra.gmra.mxu1 %vm182_vm1, %v547_v31 }
 0x23e   : > { %v1027_v32 = vpop.f32.mrf.mxu1 }
 0x240   : > { %v831_v33 = vpop.f32.mrf.mxu1 }
 0x242   : > { %v1029_v34 = vpop.f32.mrf.mxu1 }
 0x244   : > { %v832_v35 = vpop.f32.mrf.mxu1 }
 0x246   : > { %v348_v36 = vpop.f32.mrf.mxu1 }
 0x247   : > { %v349_v37 = vadd.f32 %v995_v4, %v348_v36 }
 0x248   : > { %v837_v38 = vpop.f32.mrf.mxu1 }
 0x249   : > { %v355_v39 = vsel %vm230_vm2, %v349_v37, -inf }
 0x24a   : > { %356 = vmax.xlane.f32.xlu1 %v355_v39  ;;  %v351_v40 = vpop.f32.mrf.mxu1 }
 0x24b   : > { %v352_v41 = vadd.f32 %v995_v4, %v351_v40 }
 0x24c   : > { %v838_v42 = vpop.f32.mrf.mxu1 }
 0x24d   : > { %v358_v43 = vsel %vm230_vm2, %v352_v41, -inf }
 0x24e   : > { %359 = vmax.xlane.f32.xlu0 %v358_v43  ;;  %v469_v44 = vpop.f32.mrf.mxu1 }
 0x24f   : > { %v470_v45 = vadd.f32 %v995_v4, %v469_v44 }
 0x250   : > { %v849_v46 = vpop.f32.mrf.mxu1 }
 0x251   : > { %v476_v47 = vsel %vm230_vm2, %v470_v45, -inf }
 0x252   : > { %477 = vmax.xlane.f32.xlu1 %v476_v47  ;;  %v472_v48 = vpop.f32.mrf.mxu1 }
 0x253   : > { %v473_v49 = vadd.f32 %v995_v4, %v472_v48 }
 0x254   : > { %v850_v50 = vpop.f32.mrf.mxu1 }
 0x255   : > { %v479_v51 = vsel %vm230_vm2, %v473_v49, -inf }
 0x256   : > { %480 = vmax.xlane.f32.xlu1 %v479_v51  ;;  %v590_v52 = vpop.f32.mrf.mxu1 }
 0x257   : > { %v591_v53 = vadd.f32 %v995_v4, %v590_v52 }
 0x258   : > { %v861_v54 = vpop.f32.mrf.mxu1 }
 0x259   : > { %v597_v55 = vsel %vm230_vm2, %v591_v53, -inf }
 0x25a   : > { %598 = vmax.xlane.f32.xlu0 %v597_v55  ;;  %v593_v56 = vpop.f32.mrf.mxu1 }
 0x25b   : > { %v594_v58 = vadd.f32 %v995_v4, %v593_v56 }
 0x25c   : > { %v862_v57 = vpop.f32.mrf.mxu1 }
 0x25d   : > { %v600_v59 = vsel %vm230_vm2, %v594_v58, -inf }
 0x267   : > { %495 = vrot.lane.b32.xlu1 %v1001_v13, %s944_s16 }
 0x270   : > { %374 = vrot.lane.b32.xlu0 %v1001_v13, %s943_s15 }
 0x28b   : > { %601 = vmax.xlane.f32.xlu1 %v600_v59 }
 0x29c   : > { %616 = vrot.lane.b32.xlu1 %v1001_v13, %s945_s17 }
 0x2d3   : > { %v357_v60 = vpop.xlane.xlu1 %356 }
 0x2d4   : > { %v361_v61 = vsub.f32 %v349_v37, %v357_v60 }
 0x2d6   : > { %v363_v62 = vmul.f32 1.442695, %v361_v61 }
 0x2d7   : > { %v360_v63 = vpop.xlane.xlu0 %359 }
 0x2d8   : > { %905 = vpow2.f32 %v363_v62  ;;  %v362_v1 = vsub.f32 %v352_v41, %v360_v63 }
 0x2da   : > { %v365_v2 = vmul.f32 1.442695, %v362_v1 }
 0x2db   : > { %v478_v3 = vpop.xlane.xlu1 %477 }
 0x2dc   : > { %907 = vpow2.f32 %v365_v2  ;;  %v482_v5 = vsub.f32 %v470_v45, %v478_v3 }
 0x2de   : > { %v484_v6 = vmul.f32 1.442695, %v482_v5 }
 0x2df   : > { %v481_v7 = vpop.xlane.xlu1 %480 }
 0x2e0   : > { %909 = vpow2.f32 %v484_v6  ;;  %v483_v4 = vsub.f32 %v473_v49, %v481_v7 }
 0x2e2   : > { %v486_v8 = vmul.f32 1.442695, %v483_v4 }
 0x2e3   : > { %v599_v9 = vpop.xlane.xlu0 %598  ;;  %v496_v18 = vpop.permute.xlu1 %495 }
 0x2e4   : > { %911 = vpow2.f32 %v486_v8  ;;  %v603_v10 = vsub.f32 %v591_v53, %v599_v9 }
 0x2e5   : > { %v906_v11 = vpop.eup %905 }
 0x2e6   : > { %v605_v12 = vmul.f32 1.442695, %v603_v10  ;;  %v367_v13 = vsel %vm230_vm2, %v906_v11, 0.0 }
 0x2e7   : > { %368 = vadd.xlane.f32.xlu0 %v367_v13  ;;  %v375_v14 = vpop.permute.xlu0 %374 }
 0x2e8   : > { %913 = vpow2.f32 %v605_v12  ;;  %840 = vmatpush3.bf16.msra.mxu0 %v375_v14 }
 0x2e9   : > { %v908_v15 = vpop.eup %907  ;;  %851 = vmatprep.subr.bf16.mxu0 %v941_v0 }
 0x2ea   : > { %v370_v16 = vsel %vm230_vm2, %v908_v15, 0.0  ;;  %v373_v17 = vpack.c.bf16 %v908_v15, %v906_v11 }
 0x2eb   : > { %371 = vadd.xlane.f32.xlu1 %v370_v16 }
 0x2ec   : > { %842 = vmatmul.mubr.msk.bf16.vlgmr.msra.gmra.mxu0 %vm230_vm2, %v373_v17 }
 0x2ed   : > { %v910_v19 = vpop.eup %909  ;;  %852 = vmatpush3.bf16.msra.mxu0 %v496_v18  ;;  %853 = vmatprep.mubr.msk.bf16.mxu0 %vm942_vm0, %v941_v0 }
 0x2ee   : > { %v488_v20 = vsel %vm230_vm2, %v910_v19, 0.0  ;;  %863 = vmatprep.subr.bf16.mxu0 %v941_v0 }
 0x2ef   : > { %489 = vadd.xlane.f32.xlu0 %v488_v20 }
 0x2f1   : > { %v912_v23 = vpop.eup %911 }
 0x2f2   : > { %v491_v24 = vsel %vm230_vm2, %v912_v23, 0.0  ;;  %v494_v25 = vpack.c.bf16 %v912_v23, %v910_v19 }
 0x2f3   : > { %492 = vadd.xlane.f32.xlu0 %v491_v24 }
 0x2f4   : > { %854 = vmatmul.mubr.msk.bf16.vlgmr.msra.gmra.mxu0 %vm230_vm2, %v494_v25 }
 0x2f5   : > { %v914_v26 = vpop.eup %913  ;;  %865 = vmatprep.mubr.msk.bf16.mxu0 %vm942_vm0, %v941_v0  ;;  %v246_v0 = vsel %vm230_vm2, %v1008_v22, 0.0 }
 0x2f6   : > { %v609_v27 = vsel %vm230_vm2, %v914_v26, 0.0 }
 0x2f7   : > { %610 = vadd.xlane.f32.xlu1 %v609_v27 }
 0x2fb   : > { %244 = vadd.xlane.f32.xlu1 %v243_v28 }
 0x314   : > { %v602_v29 = vpop.xlane.xlu1 %601 }
 0x315   : > { %v604_v30 = vsub.f32 %v594_v58, %v602_v29 }
 0x317   : > { %v607_v31 = vmul.f32 1.442695, %v604_v30 }
 0x318   : > { %v617_v33 = vpop.permute.xlu1 %616 }
 0x319   : > { %915 = vpow2.f32 %v607_v31  ;;  %864 = vmatpush3.bf16.msra.mxu0 %v617_v33 }
 0x326   : > { %v916_v35 = vpop.eup %915 }
 0x327   : > { %v612_v36 = vsel %vm230_vm2, %v916_v35, 0.0  ;;  %v615_v37 = vpack.c.bf16 %v916_v35, %v914_v26 }
 0x328   : > { %613 = vadd.xlane.f32.xlu0 %v612_v36 }
 0x329   : > { %866 = vmatmul.mubr.msk.bf16.vlgmr.msra.gmra.mxu0 %vm230_vm2, %v615_v37 }
 0x32c   : > { %247 = vadd.xlane.f32.xlu0 %v246_v0 }
 0x370   : > { %v369_v38 = vpop.xlane.xlu0 %368 }
 0x371   : > { %917 = vrcp.f32 %v369_v38 }
 0x374   : > { %v372_v21 = vpop.xlane.xlu1 %371 }
 0x375   : > { %919 = vrcp.f32 %v372_v21 }
 0x378   : > { %v490_v39 = vpop.xlane.xlu0 %489 }
 0x379   : > { %921 = vrcp.f32 %v490_v39 }
 0x37c   : > { %v493_v40 = vpop.xlane.xlu0 %492 }
 0x37d   : > { %923 = vrcp.f32 %v493_v40 }
 0x37e   : > { %v918_v43 = vpop.eup %917 }
 0x380   : > { %v611_v58 = vpop.xlane.xlu1 %610 }
 0x381   : > { %925 = vrcp.f32 %v611_v58 }
 0x382   : > { %v920_v44 = vpop.eup %919 }
 0x384   : > { %v245_v7 = vpop.xlane.xlu1 %244 }
 0x386   : > { %v922_v51 = vpop.eup %921 }
 0x38a   : > { %v924_v52 = vpop.eup %923 }
 0x38e   : > { %v926_v62 = vpop.eup %925 }
 0x3ac   : > { %v414_v41 = vpop.f32.mrf.mxu0 }
 0x3ad   : > { %v423_v46 = vmul.f32 %v918_v43, %v414_v41 }
 0x3ae   : > { %v843_v42 = vpop.f32.mrf.mxu0 }
 0x3b0   : > { %v417_v45 = vpop.f32.mrf.mxu0 }
 0x3b1   : > { %v424_v47 = vmul.f32 %v920_v44, %v417_v45  ;;  %v614_v59 = vpop.xlane.xlu0 %613 }
 0x3b2   : > { %v844_v48 = vpop.f32.mrf.mxu0  ;;  %927 = vrcp.f32 %v614_v59 }
 0x3b3   : > { %v883_v49 = vpack.i.bf16 %v424_v47, %v423_v46  ;;  %929 = vrcp.f32 %v245_v7 }
 0x3b4   : > { %v535_v50 = vpop.f32.mrf.mxu0 }
 0x3b5   : > { %884 = vrot.lane.b32.xlu1 %v883_v49, %s945_s17  ;;  %v544_v54 = vmul.f32 %v922_v51, %v535_v50  ;;  %v248_v4 = vpop.xlane.xlu0 %247 }
 0x3b6   : > { %v855_v22 = vpop.f32.mrf.mxu0  ;;  %931 = vrcp.f32 %v248_v4 }
 0x3b8   : > { %v538_v53 = vpop.f32.mrf.mxu0 }
 0x3b9   : > { %v545_v55 = vmul.f32 %v924_v52, %v538_v53 }
 0x3ba   : > { %v856_v56 = vpop.f32.mrf.mxu0 }
 0x3bb   : > { %v888_v57 = vpack.i.bf16 %v545_v55, %v544_v54 }
 0x3bd   : > { %889 = vrot.lane.b32.xlu0 %v888_v57, %s944_s16 }
 0x3bf   : > { %v928_v63 = vpop.eup %927 }
 0x3c0   : > { %v930_v9 = vpop.eup %929 }
 0x3c1   : > { %v302_v16 = vmul.f32 %v930_v9, %v1027_v32 }
 0x3c3   : > { %v932_v11 = vpop.eup %931 }
 0x3c4   : > { %v303_v17 = vmul.f32 %v932_v11, %v1029_v34 }
 0x3e9   : > { %v656_v60 = vpop.f32.mrf.mxu0 }
 0x3ea   : > { %v665_v2 = vmul.f32 %v926_v62, %v656_v60 }
 0x3eb   : > { %v867_v61 = vpop.f32.mrf.mxu0 }
 0x3ed   : > { %v659_v1 = vpop.f32.mrf.mxu0 }
 0x3ee   : > { %v666_v3 = vmul.f32 %v928_v63, %v659_v1 }
 0x3ef   : > { %v868_v5 = vpop.f32.mrf.mxu0 }
 0x3f0   : > { %v893_v6 = vpack.i.bf16 %v666_v3, %v665_v2 }
 0x3f2   : > { %894 = vrot.lane.b32.xlu1 %v893_v6, %s943_s15 }
 0x427   : > { %v885_v8 = vpop.permute.xlu1 %884 }
 0x428   : > { %v887_v12 = vunpack.i.h.bf16 %v885_v8  ;;  %v886_v13 = vunpack.i.l.bf16 %v885_v8 }
 0x42a   : > { %v692_v19 = vsel %vm182_vm1, %v303_v17, %v887_v12  ;;  %v691_v20 = vsel %vm182_vm1, %v302_v16, %v886_v13 }
 0x42f   : > { %v890_v10 = vpop.permute.xlu0 %889 }
 0x430   : > { %v892_v14 = vunpack.i.h.bf16 %v890_v10  ;;  %v891_v15 = vunpack.i.l.bf16 %v890_v10 }
 0x432   : > { %v695_v25 = vsel %vm693_vm3, %v692_v19, %v892_v14  ;;  %v694_v26 = vsel %vm693_vm3, %v691_v20, %v891_v15 }
 0x464   : > { %v895_v18 = vpop.permute.xlu1 %894 }
 0x465   : > { %v897_v23 = vunpack.i.h.bf16 %v895_v18  ;;  %v896_v24 = vunpack.i.l.bf16 %v895_v18 }
 0x467   : > { %v698_v27 = vsel %vm696_vm4, %v695_v25, %v897_v23  ;;  %v697_v32 = vsel %vm696_vm4, %v694_v26, %v896_v24 }
 0x468   : > { %v803_v28 = vpack.c.bf16 %v698_v27, %v697_v32 }
 0x46a   : > { %804 = vst [vmem:[%s157_s24] sm:$0xff] %v803_v28  }
 0x46b PF: > { %s12_s9 = sadd.s32 1, %s939_s9  }
 0x46c   : > { %p9_p4 = scmp.ge.s32.totalorder %s12_s9, 4  }
 0x46e   :  { %11 = sbr.rel (!%p9_p4) target bundleno = 1 (0x1), region = 61 }

// kernel: vilt_meme_sentiment_forward.15
= control target key start
LH: loop header
LB: loop body
LE: loop exit
PB: predicated region body
PF: predicated region fallthrough
CT: control target
= control target key end

     0   :  { %s339_s1 = inlined_call_operand.vmem [shape: bf16[128,128], index: 1, kind: input, shape index: {}]   ;;  %s340_s0 = inlined_call_operand.vmem [shape: bf16[32,128], index: 0, kind: input, shape index: {}]   ;;  %s341_s2 = inlined_call_operand.vmem [shape: f32[1,128], index: 2, kind: input, shape index: {}]   ;;  %s342_s3 = inlined_call_operand.vmem [shape: bf16[32,128], index: 3, kind: input, shape index: {}]   ;;  %s343_s4 = inlined_call_operand.vmem [shape: bf16[32,128], index: 4, kind: output, shape index: {}]  }
   0x1   :  { %v259_v0 = vld [vmem:[%s339_s1 + $0x38] sm:$0xff]   ;;  %v260_v1 = vld [vmem:[%s339_s1 + $0x30] sm:$0xff]   ;;  %v261_v2 = vld [vmem:[%s339_s1 + $0x28] sm:$0xff]  }
   0x2   :  { %239 = vmatprep.subr.bf16.mxu0 %v259_v0  ;;  %v262_v3 = vld [vmem:[%s339_s1 + $0x20] sm:$0xff]   ;;  %v263_v5 = vld [vmem:[%s339_s1 + $0x18] sm:$0xff]   ;;  %v264_v6 = vld [vmem:[%s339_s1 + $0x10] sm:$0xff]  }
   0x3   :  { %240 = vmatpush3.bf16.msra.mxu0 %v259_v0  ;;  %v267_v4 = vld [vmem:[%s340_s0] sm:$0xff]   ;;  %v265_v7 = vld [vmem:[%s339_s1 + $0x8] sm:$0xff]  }
   0x4   :  { %241 = vmatprep.subr.bf16.mxu0 %v260_v1  ;;  %255 = vmatprep.mubr.bf16.mxu0 %v267_v4  ;;  %v266_v8 = vld [vmem:[%s339_s1] sm:$0xff]   ;;  %v268_v9 = vld [vmem:[%s340_s0 + $0x8] sm:$0xff]  }
   0x5   :  { %v190_v11 = vld [vmem:[%s341_s2] ss:$0 sm:$0xff]  ;;  %v227_v12 = vld [vmem:[%s342_s3 + $0x8] sm:$0xff]  }
   0x6   :  { %v210_v14 = vld [vmem:[%s342_s3] sm:$0xff]   ;;  %v215_v16 = vunpack.c.l.bf16 %v227_v12  ;;  %v216_v17 = vunpack.c.h.bf16 %v227_v12 }
   0x7   :  { %242 = vmatpush3.bf16.msra.mxu0 %v260_v1  ;;  %v211_v20 = vunpack.c.l.bf16 %v210_v14  ;;  %v212_v22 = vunpack.c.h.bf16 %v210_v14 }
   0x8   :  { %243 = vmatprep.subr.bf16.mxu0 %v261_v2 }
   0xb   :  { %244 = vmatpush3.bf16.msra.mxu0 %v261_v2 }
   0xc   :  { %245 = vmatprep.subr.bf16.mxu0 %v262_v3 }
   0xf   :  { %246 = vmatpush3.bf16.msra.mxu0 %v262_v3 }
  0x10   :  { %247 = vmatprep.subr.bf16.mxu0 %v263_v5 }
  0x13   :  { %248 = vmatpush3.bf16.msra.mxu0 %v263_v5 }
  0x14   :  { %249 = vmatprep.subr.bf16.mxu0 %v264_v6 }
  0x17   :  { %250 = vmatpush3.bf16.msra.mxu0 %v264_v6 }
  0x18   :  { %251 = vmatprep.subr.bf16.mxu0 %v265_v7 }
  0x1b   :  { %252 = vmatpush3.bf16.msra.mxu0 %v265_v7 }
  0x1c   :  { %253 = vmatprep.subr.bf16.mxu0 %v266_v8 }
  0x1f   :  { %254 = vmatpush3.bf16.msra.mxu0 %v266_v8 }
  0x22   :  { %256 = vmatmul.mubr.bf16.vlgmr.msra.gmra.mxu0 %v268_v9 }
  0xe2   :  { %v257_v10 = vpop.f32.mrf.mxu0 }
  0xe3   :  { %v148_v15 = vadd.f32 %v257_v10, %v190_v11 }
  0xe4   :  { %v139_v13 = vpop.f32.mrf.mxu0 }
  0xe5   :  { %v140_v19 = vadd.f32 %v190_v11, %v139_v13  ;;  %v164_v24 = vadd.f32 %v215_v16, %v148_v15 }
  0xe6   :  { %v258_v18 = vpop.f32.mrf.mxu0 }
  0xe7   :  { %v151_v21 = vadd.f32 %v258_v18, %v190_v11  ;;  %v162_v27 = vadd.f32 %v211_v20, %v140_v19 }
  0xe8   :  { %v142_v23 = vpop.f32.mrf.mxu0 }
  0xe9   :  { %v165_v25 = vadd.f32 %v216_v17, %v151_v21  ;;  %v143_v26 = vadd.f32 %v190_v11, %v142_v23 }
  0xeb   :  { %v225_v28 = vpack.c.bf16 %v165_v25, %v164_v24  ;;  %v163_v29 = vadd.f32 %v212_v22, %v143_v26 }
  0xed   :  { %228 = vst [vmem:[%s343_s4 + $0x8] sm:$0xff] %v225_v28   ;;  %v220_v30 = vpack.c.bf16 %v163_v29, %v162_v27 }
  0xef   :  { %221 = vst [vmem:[%s343_s4] sm:$0xff] %v220_v30  }

// kernel: vilt_meme_sentiment_forward.16
= control target key start
LH: loop header
LB: loop body
LE: loop exit
PB: predicated region body
PF: predicated region fallthrough
CT: control target
= control target key end

     0   :  { %v782_v38 = vmov 0   ;;  %s983_s0 = inlined_call_operand.vmem [shape: bf16[32,128], index: 0, kind: input, shape index: {}]   ;;  %s984_s1 = inlined_call_operand.vmem [shape: bf16[128,256], index: 1, kind: input, shape index: {}]   ;;  %s985_s5 = inlined_call_operand.vmem [shape: f32[1,128], index: 5, kind: input, shape index: {}]   ;;  %s986_s6 = inlined_call_operand.vmem [shape: f32[1,128], index: 6, kind: input, shape index: {}]   ;;  %s987_s3 = inlined_call_operand.vmem [shape: bf16[256,128], index: 3, kind: input, shape index: {}]   ;;  %s988_s2 = inlined_call_operand.vmem [shape: f32[1,256], index: 2, kind: input, shape index: {}]   ;;  %s989_s4 = inlined_call_operand.vmem [shape: f32[1,128], index: 4, kind: input, shape index: {}]   ;;  %s990_s7 = inlined_call_operand.vmem [shape: bf16[32,128], index: 7, kind: output, shape index: {}]  }
   0x1   :  { %v648_v0 = vld [vmem:[%s983_s0] sm:$0xff]   ;;  %v683_v1 = vld [vmem:[%s983_s0 + $0x8] sm:$0xff]   ;;  %v716_v22 = vld [vmem:[%s984_s1 + $0x74] ss:$8 sps:$4 sm:$0xff]   ;;  %286 = vmatprep.mubr.bf16.mxu0 %v782_v38 }
   0x2   :  { %v829_v2 = vunpack.c.l.bf16 %v648_v0  ;;  %v831_v3 = vunpack.c.l.bf16 %v683_v1  ;;  %v835_v4 = vunpack.c.h.bf16 %v648_v0  ;;  %v837_v5 = vunpack.c.h.bf16 %v683_v1  ;;  %v718_v23 = vld [vmem:[%s984_s1 + $0x70] ss:$8 sps:$4 sm:$0xff]   ;;  %254 = vmatprep.subr.bf16.mxu0 %v716_v22  ;;  %v719_v24 = vld [vmem:[%s984_s1 + $0x64] ss:$8 sps:$4 sm:$0xff]   ;;  %v721_v25 = vld [vmem:[%s984_s1 + $0x60] ss:$8 sps:$4 sm:$0xff]  }
   0x3   :  { %255 = vmatpush1.bf16.msra.mxu0 %v718_v23  ;;  %v722_v26 = vld [vmem:[%s984_s1 + $0x54] ss:$8 sps:$4 sm:$0xff]   ;;  %v724_v27 = vld [vmem:[%s984_s1 + $0x50] ss:$8 sps:$4 sm:$0xff]   ;;  %v725_v28 = vld [vmem:[%s984_s1 + $0x44] ss:$8 sps:$4 sm:$0xff]  }
   0x4   :  { %39 = vadd.xlane.f32.xlu0 %v829_v2  ;;  %43 = vadd.xlane.f32.xlu1 %v831_v3  ;;  %v727_v29 = vld [vmem:[%s984_s1 + $0x40] ss:$8 sps:$4 sm:$0xff]   ;;  %v728_v30 = vld [vmem:[%s984_s1 + $0x34] ss:$8 sps:$4 sm:$0xff]   ;;  %v730_v31 = vld [vmem:[%s984_s1 + $0x30] ss:$8 sps:$4 sm:$0xff]  }
   0x5   :  { %256 = vmatprep.subr.bf16.mxu0 %v719_v24  ;;  %v731_v32 = vld [vmem:[%s984_s1 + $0x24] ss:$8 sps:$4 sm:$0xff]   ;;  %v733_v33 = vld [vmem:[%s984_s1 + $0x20] ss:$8 sps:$4 sm:$0xff]   ;;  %v734_v34 = vld [vmem:[%s984_s1 + $0x14] ss:$8 sps:$4 sm:$0xff]  }
   0x6   :  { %v736_v35 = vld [vmem:[%s984_s1 + $0x10] ss:$8 sps:$4 sm:$0xff]   ;;  %v737_v36 = vld [vmem:[%s984_s1 + $0x4] ss:$8 sps:$4 sm:$0xff]   ;;  %v739_v37 = vld [vmem:[%s984_s1] ss:$8 sps:$4 sm:$0xff]  }
   0x7   :  { %257 = vmatpush1.bf16.msra.mxu0 %v721_v25  ;;  %v594_v53 = vld [vmem:[%s985_s5] ss:$0 sm:$0xff]  ;;  %v751_v22 = vld [vmem:[%s987_s3 + $0x18] sm:$0xff]   ;;  %v752_v23 = vld [vmem:[%s987_s3 + $0x50] sm:$0xff]  }
   0x8   :  { %41 = vadd.xlane.f32.xlu0 %v835_v4  ;;  %45 = vadd.xlane.f32.xlu1 %v837_v5  ;;  %v595_v58 = vld [vmem:[%s986_s6] ss:$0 sm:$0xff]  ;;  %v753_v24 = vld [vmem:[%s987_s3 + $0x10] sm:$0xff]   ;;  %v754_v25 = vld [vmem:[%s987_s3 + $0x48] sm:$0xff]  }
   0x9   :  { %258 = vmatprep.subr.bf16.mxu0 %v722_v26  ;;  %v755_v26 = vld [vmem:[%s987_s3 + $0x8] sm:$0xff]  }
   0xb   :  { %259 = vmatpush1.bf16.msra.mxu0 %v724_v27  ;;  %v756_v27 = vld [vmem:[%s987_s3 + $0x40] sm:$0xff]  }
   0xc   :  { %260 = vmatprep.subr.bf16.mxu0 %v725_v28  ;;  %v757_v28 = vld [vmem:[%s987_s3] sm:$0xff]  }
   0xf   :  { %261 = vmatpush1.bf16.msra.mxu0 %v727_v29  ;;  %v152_v29 = vlaneseq }
  0x10   :  { %262 = vmatprep.subr.bf16.mxu0 %v728_v30 }
  0x11   :  { %v153_v30 = vshrl.u32 %v152_v29, 7 }
  0x13   :  { %263 = vmatpush1.bf16.msra.mxu0 %v730_v31  ;;  %v154_v31 = vsub.s32 0, %v153_v30 }
  0x14   :  { %264 = vmatprep.subr.bf16.mxu0 %v731_v32  ;;  %v150_v32 = vld [vmem:[%s988_s2] sm:$0x3] }
  0x17   :  { %265 = vmatpush1.bf16.msra.mxu0 %v733_v33  ;;  %v158_v33 = vsub.s32 1, %v153_v30 }
  0x18   :  { %266 = vmatprep.subr.bf16.mxu0 %v734_v34  ;;  %v155_v34 = vrot.slane %v150_v32, %v154_v31 }
  0x1b   :  { %267 = vmatpush1.bf16.msra.mxu0 %v736_v35  ;;  %v159_v35 = vrot.slane %v150_v32, %v158_v33 }
  0x1c   :  { %268 = vmatprep.subr.bf16.mxu0 %v737_v36 }
  0x1f   :  { %269 = vmatpush1.bf16.msra.mxu0 %v739_v37 }
  0x8d   :  { %v40_v6 = vpop.xlane.xlu0 %39  ;;  %v44_v7 = vpop.xlane.xlu1 %43 }
  0x8e   :  { %v48_v8 = vmul.f32 0.0078125, %v40_v6  ;;  %v50_v9 = vmul.f32 0.0078125, %v44_v7 }
  0x90   :  { %v842_v10 = vsub.f32 %v829_v2, %v48_v8  ;;  %v845_v11 = vsub.f32 %v831_v3, %v50_v9 }
  0x91   :  { %v42_v12 = vpop.xlane.xlu0 %41  ;;  %v46_v13 = vpop.xlane.xlu1 %45 }
  0x92   :  { %v49_v14 = vmul.f32 0.0078125, %v42_v12  ;;  %v56_v15 = vmul.f32 %v842_v10, %v842_v10  ;;  %v51_v16 = vmul.f32 0.0078125, %v46_v13  ;;  %v58_v19 = vmul.f32 %v845_v11, %v845_v11 }
  0x94   :  { %v850_v17 = vsub.f32 %v835_v4, %v49_v14  ;;  %60 = vadd.xlane.f32.xlu0 %v56_v15  ;;  %v853_v18 = vsub.f32 %v837_v5, %v51_v16  ;;  %v743_v14 = vld [vmem:[%s987_s3 + $0x38] sm:$0xff]   ;;  %v744_v15 = vld [vmem:[%s987_s3 + $0x70] sm:$0xff]  }
  0x95   :  { %v745_v16 = vld [vmem:[%s987_s3 + $0x30] sm:$0xff]  }
  0x96   :  { %v57_v20 = vmul.f32 %v850_v17, %v850_v17  ;;  %v59_v21 = vmul.f32 %v853_v18, %v853_v18 }
  0x98   :  { %64 = vadd.xlane.f32.xlu0 %v58_v19  ;;  %62 = vadd.xlane.f32.xlu1 %v57_v20  ;;  %v748_v19 = vld [vmem:[%s987_s3 + $0x60] sm:$0xff]  }
  0x99   :  { %v749_v20 = vld [vmem:[%s987_s3 + $0x20] sm:$0xff]  }
  0x9c   :  { %66 = vadd.xlane.f32.xlu1 %v59_v21  ;;  %v750_v21 = vld [vmem:[%s987_s3 + $0x58] sm:$0xff]  }
 0x11d   :  { %v61_v39 = vpop.xlane.xlu0 %60 }
 0x11e   :  { %v68_v40 = vmul.f32 0.0078125, %v61_v39 }
 0x120   :  { %v72_v41 = vadd.f32 1e-12, %v68_v40 }
 0x121   :  { %v63_v42 = vpop.xlane.xlu1 %62  ;;  %v65_v43 = vpop.xlane.xlu0 %64 }
 0x122   :  { %758 = vrsqrt.f32 %v72_v41  ;;  %v69_v44 = vmul.f32 0.0078125, %v63_v42  ;;  %v70_v45 = vmul.f32 0.0078125, %v65_v43 }
 0x124   :  { %v73_v46 = vadd.f32 1e-12, %v69_v44  ;;  %v74_v47 = vadd.f32 1e-12, %v70_v45 }
 0x125   :  { %v67_v48 = vpop.xlane.xlu1 %66 }
 0x126   :  { %760 = vrsqrt.f32 %v73_v46  ;;  %v71_v49 = vmul.f32 0.0078125, %v67_v48 }
 0x127   :  { %762 = vrsqrt.f32 %v74_v47 }
 0x128   :  { %v75_v50 = vadd.f32 1e-12, %v71_v49 }
 0x12a   :  { %764 = vrsqrt.f32 %v75_v50 }
 0x12f   :  { %v759_v51 = vpop.eup %758 }
 0x130   :  { %v80_v52 = vmul.f32 %v759_v51, %v842_v10 }
 0x132   :  { %v91_v56 = vmul.f32 %v594_v53, %v80_v52 }
 0x133   :  { %v761_v54 = vpop.eup %760 }
 0x134   :  { %v763_v55 = vpop.eup %762  ;;  %v81_v57 = vmul.f32 %v761_v54, %v850_v17  ;;  %v102_v62 = vadd.f32 %v595_v58, %v91_v56  ;;  %v746_v17 = vld [vmem:[%s987_s3 + $0x68] sm:$0xff]  }
 0x135   :  { %v82_v59 = vmul.f32 %v763_v55, %v845_v11  ;;  %v742_v11 = vld [vmem:[%s987_s3 + $0x78] sm:$0xff]  }
 0x136   :  { %v92_v60 = vmul.f32 %v594_v53, %v81_v57  ;;  %687 = vmatprep.subr.bf16.mxu1 %v742_v11 }
 0x137   :  { %v765_v61 = vpop.eup %764  ;;  %v93_v0 = vmul.f32 %v594_v53, %v82_v59  ;;  %688 = vmatpush3.bf16.msra.mxu1 %v743_v14 }
 0x138   :  { %v103_v63 = vadd.f32 %v595_v58, %v92_v60  ;;  %v83_v1 = vmul.f32 %v765_v61, %v853_v18  ;;  %689 = vmatprep.subr.bf16.mxu1 %v744_v15  ;;  %v747_v18 = vld [vmem:[%s987_s3 + $0x28] sm:$0xff]  }
 0x139   :  { %v104_v8 = vadd.f32 %v595_v58, %v93_v0 }
 0x13a   :  { %v658_v6 = vpack.c.bf16 %v103_v63, %v102_v62  ;;  %v94_v7 = vmul.f32 %v594_v53, %v83_v1 }
 0x13b   :  { %690 = vmatpush3.bf16.msra.mxu1 %v745_v16 }
 0x13c   :  { %659 = vst [vmem:[#allocation2] sm:$0xff] %v658_v6   ;;  %v105_v9 = vadd.f32 %v595_v58, %v94_v7  ;;  %691 = vmatprep.subr.bf16.mxu1 %v746_v17 }
 0x13e   :  { %v663_v10 = vpack.c.bf16 %v105_v9, %v104_v8 }
 0x13f   :  { %692 = vmatpush3.bf16.msra.mxu1 %v747_v18 }
 0x140   :  { %684 = vst [vmem:[#allocation2 + $0x8] sm:$0xff] %v663_v10   ;;  %693 = vmatprep.subr.bf16.mxu1 %v748_v19 }
 0x143   :  { %v740_v12 = vld [vmem:[#allocation2] sm:$0xff]   ;;  %694 = vmatpush3.bf16.msra.mxu1 %v749_v20 }
 0x144   :  { %287 = vmatmul.mubr.bf16.vlgmr.msra.gmra.mxu0 %v740_v12  ;;  %695 = vmatprep.subr.bf16.mxu1 %v750_v21 }
 0x145   :  { %296 = vmatprep.mubr.bf16.mxu0 %v782_v38 }
 0x147   :  { %v741_v13 = vld [vmem:[#allocation2 + $0x8] sm:$0xff]   ;;  %696 = vmatpush3.bf16.msra.mxu1 %v751_v22 }
 0x148   :  { %697 = vmatprep.subr.bf16.mxu1 %v752_v23 }
 0x14b   :  { %698 = vmatpush3.bf16.msra.mxu1 %v753_v24 }
 0x14c   :  { %297 = vmatmul.mubr.bf16.gmra.mxu0 %v741_v13  ;;  %699 = vmatprep.subr.bf16.mxu1 %v754_v25 }
 0x14f   :  { %700 = vmatpush3.bf16.msra.mxu1 %v755_v26 }
 0x150   :  { %701 = vmatprep.subr.bf16.mxu1 %v756_v27 }
 0x153   :  { %702 = vmatpush3.bf16.msra.mxu1 %v757_v28 }
 0x204   :  { %v288_v36 = vpop.f32.mrf.mxu0 }
 0x205   :  { %v289_v37 = vadd.f32 %v288_v36, %v155_v34 }
 0x206   :  { %v290_v38 = vpop.f32.mrf.mxu0 }
 0x207   :  { %v291_v39 = vadd.f32 %v290_v38, %v159_v35  ;;  %v315_v40 = vmul.f32 0.70710677, %v289_v37  ;;  %v307_v12 = vmul.f32 0.5, %v289_v37 }
 0x208   :  { %v292_v41 = vpop.f32.mrf.mxu0 }
 0x209   :  { %v316_v42 = vmul.f32 0.70710677, %v291_v39  ;;  %v293_v43 = vadd.f32 %v292_v41, %v155_v34  ;;  %v308_v8 = vmul.f32 0.5, %v291_v39  ;;  %v634_v39 = vld [vmem:[%s989_s4] ss:$0 sm:$0xff] }
 0x20a   :  { %v294_v44 = vpop.f32.mrf.mxu0 }
 0x20b   :  { %766 = verf.f32 %v316_v42  ;;  %v317_v45 = vmul.f32 0.70710677, %v293_v43  ;;  %v295_v46 = vadd.f32 %v294_v44, %v159_v35  ;;  %v309_v7 = vmul.f32 0.5, %v293_v43 }
 0x20c   :  { %768 = verf.f32 %v315_v40  ;;  %v298_v47 = vpop.f32.mrf.mxu0 }
 0x20d   :  { %770 = verf.f32 %v317_v45  ;;  %v318_v48 = vmul.f32 0.70710677, %v295_v46  ;;  %v299_v49 = vadd.f32 %v298_v47, %v155_v34  ;;  %v310_v9 = vmul.f32 0.5, %v295_v46 }
 0x20e   :  { %v300_v50 = vpop.f32.mrf.mxu0 }
 0x20f   :  { %772 = verf.f32 %v318_v48  ;;  %v301_v51 = vadd.f32 %v300_v50, %v159_v35  ;;  %v319_v52 = vmul.f32 0.70710677, %v299_v49  ;;  %v311_v29 = vmul.f32 0.5, %v299_v49 }
 0x210   :  { %v302_v53 = vpop.f32.mrf.mxu0 }
 0x211   :  { %v320_v54 = vmul.f32 0.70710677, %v301_v51  ;;  %v303_v55 = vadd.f32 %v302_v53, %v155_v34  ;;  %v312_v26 = vmul.f32 0.5, %v301_v51 }
 0x212   :  { %v304_v56 = vpop.f32.mrf.mxu0 }
 0x213   :  { %774 = verf.f32 %v320_v54  ;;  %v321_v57 = vmul.f32 0.70710677, %v303_v55  ;;  %v305_v58 = vadd.f32 %v304_v56, %v159_v35  ;;  %v313_v25 = vmul.f32 0.5, %v303_v55 }
 0x214   :  { %776 = verf.f32 %v319_v52 }
 0x215   :  { %778 = verf.f32 %v321_v57  ;;  %v322_v59 = vmul.f32 0.70710677, %v305_v58  ;;  %v314_v27 = vmul.f32 0.5, %v305_v58 }
 0x217   :  { %780 = verf.f32 %v322_v59 }
 0x218   :  { %v767_v60 = vpop.eup %766 }
 0x219   :  { %v769_v61 = vpop.eup %768  ;;  %v332_v0 = vadd.f32 1.0, %v767_v60 }
 0x21a   :  { %v771_v62 = vpop.eup %770  ;;  %v331_v6 = vadd.f32 1.0, %v769_v61 }
 0x21b   :  { %v333_v63 = vadd.f32 1.0, %v771_v62  ;;  %v340_v11 = vmul.f32 %v332_v0, %v308_v8 }
 0x21c   :  { %v773_v1 = vpop.eup %772  ;;  %v339_v16 = vmul.f32 %v331_v6, %v307_v12 }
 0x21d   :  { %v334_v10 = vadd.f32 1.0, %v773_v1  ;;  %v341_v13 = vmul.f32 %v333_v63, %v309_v7 }
 0x21f   :  { %v342_v14 = vmul.f32 %v334_v10, %v310_v9  ;;  %v351_v20 = vpack.c.bf16 %v341_v13, %v339_v16 }
 0x220   :  { %v775_v15 = vpop.eup %774 }
 0x221   :  { %v777_v17 = vpop.eup %776  ;;  %v352_v18 = vpack.c.bf16 %v342_v14, %v340_v11  ;;  %v336_v21 = vadd.f32 1.0, %v775_v15 }
 0x222   :  { %v779_v19 = vpop.eup %778  ;;  %v335_v24 = vadd.f32 1.0, %v777_v17 }
 0x223   :  { %v337_v22 = vadd.f32 1.0, %v779_v19  ;;  %515 = vmatprep.mubr.bf16.mxu1 %v352_v18  ;;  %v344_v31 = vmul.f32 %v336_v21, %v312_v26 }
 0x224   :  { %v781_v23 = vpop.eup %780  ;;  %516 = vmatmul.mubr.bf16.vlgmr.msra.gmra.mxu1 %v351_v20  ;;  %v343_v33 = vmul.f32 %v335_v24, %v311_v29 }
 0x225   :  { %v338_v28 = vadd.f32 1.0, %v781_v23  ;;  %v345_v30 = vmul.f32 %v337_v22, %v313_v25 }
 0x227   :  { %v346_v32 = vmul.f32 %v338_v28, %v314_v27  ;;  %v353_v35 = vpack.c.bf16 %v345_v30, %v343_v33 }
 0x229   :  { %v354_v34 = vpack.c.bf16 %v346_v32, %v344_v31 }
 0x22b   :  { %523 = vmatprep.mubr.bf16.mxu1 %v354_v34 }
 0x22c   :  { %524 = vmatmul.mubr.bf16.gmra.mxu1 %v353_v35 }
 0x2e4   :  { %v703_v36 = vpop.f32.mrf.mxu1 }
 0x2e6   :  { %v704_v37 = vpop.f32.mrf.mxu1 }
 0x2e7   :  { %v705_v38 = vadd.f32 %v704_v37, %v703_v36 }
 0x2e8   :  { %v706_v40 = vpop.f32.mrf.mxu1 }
 0x2e9   :  { %v554_v42 = vadd.f32 %v705_v38, %v634_v39 }
 0x2ea   :  { %v707_v41 = vpop.f32.mrf.mxu1 }
 0x2eb   :  { %v708_v43 = vadd.f32 %v707_v41, %v706_v40  ;;  %v566_v47 = vadd.f32 %v829_v2, %v554_v42 }
 0x2ec   :  { %v709_v44 = vpop.f32.mrf.mxu1 }
 0x2ed   :  { %v555_v45 = vadd.f32 %v708_v43, %v634_v39 }
 0x2ee   :  { %v710_v46 = vpop.f32.mrf.mxu1 }
 0x2ef   :  { %v567_v48 = vadd.f32 %v835_v4, %v555_v45  ;;  %v711_v49 = vadd.f32 %v710_v46, %v709_v44 }
 0x2f0   :  { %v712_v50 = vpop.f32.mrf.mxu1 }
 0x2f1   :  { %v676_v51 = vpack.c.bf16 %v567_v48, %v566_v47  ;;  %v556_v53 = vadd.f32 %v711_v49, %v634_v39 }
 0x2f2   :  { %v713_v52 = vpop.f32.mrf.mxu1 }
 0x2f3   :  { %677 = vst [vmem:[%s990_s7] sm:$0xff] %v676_v51   ;;  %v714_v54 = vadd.f32 %v713_v52, %v712_v50  ;;  %v568_v56 = vadd.f32 %v831_v3, %v556_v53 }
 0x2f5   :  { %v557_v55 = vadd.f32 %v714_v54, %v634_v39 }
 0x2f7   :  { %v569_v57 = vadd.f32 %v837_v5, %v557_v55 }
 0x2f9   :  { %v681_v58 = vpack.c.bf16 %v569_v57, %v568_v56 }
 0x2fb   :  { %686 = vst [vmem:[%s990_s7 + $0x8] sm:$0xff] %v681_v58  }

// kernel: vilt_meme_sentiment_forward.21
= control target key start
LH: loop header
LB: loop body
LE: loop exit
PB: predicated region body
PF: predicated region fallthrough
CT: control target
= control target key end

     0   :  { %vm30_vm0 = vcmask 1041408   ;;  %s553_s0 = inlined_call_operand.vmem [shape: bf16[2,128], index: 0, kind: input, shape index: {}]   ;;  %s554_s1 = inlined_call_operand.vmem [shape: f32[1,128], index: 1, kind: input, shape index: {}]   ;;  %s555_s2 = inlined_call_operand.vmem [shape: f32[1,128], index: 2, kind: input, shape index: {}]   ;;  %s556_s3 = inlined_call_operand.vmem [shape: bf16[128,128], index: 3, kind: input, shape index: {}]   ;;  %s557_s4 = inlined_call_operand.vmem [shape: f32[1,128], index: 4, kind: input, shape index: {}]   ;;  %s558_s5 = inlined_call_operand.vmem [shape: bf16[128,128], index: 5, kind: input, shape index: {}]   ;;  %s559_s6 = inlined_call_operand.vmem [shape: f32[1,128], index: 6, kind: input, shape index: {}]   ;;  %s560_s7 = inlined_call_operand.hbm [shape: f32[2,128], index: 7, kind: output, shape index: {}]  }
   0x1   :  { %v28_v0 = vld [vmem:[%s553_s0] sm:$0x1] }
   0x2   :  { %v29_v1 = vunpack.c.l.bf16 %v28_v0 }
   0x4   :  { %v31_v2 = vsel %vm30_vm0, %v29_v1, 0.0 }
   0x5   :  { %32 = vadd.xlane.f32.xlu0 %v31_v2 }
   0x6   :  { %12 = vsyncpa [#allocation3], 0  ;;  %v382_v3 = vld [vmem:[%s556_s3 + $0x38] sm:$0xff]   ;;  %v424_v4 = vmov 0.0   ;;  %v383_v5 = vld [vmem:[%s556_s3 + $0x30] sm:$0xff]   ;;  %vm425_vm1 = vmmov 0  }
   0x7   :  { %339 = vmatprep.subr.bf16.mxu0 %v424_v4  ;;  %359 = vmatprep.subr.bf16.mxu1 %v424_v4  ;;  %v384_v11 = vld [vmem:[%s556_s3 + $0x28] sm:$0xff]   ;;  %v385_v12 = vld [vmem:[%s556_s3 + $0x20] sm:$0xff]   ;;  %v386_v13 = vld [vmem:[%s556_s3 + $0x18] sm:$0xff]  }
   0x8   :  { %340 = vmatpush3.bf16.msra.mxu0 %v382_v3  ;;  %355 = vmatprep.mubr.msk.bf16.mxu0 %vm425_vm1, %v424_v4  ;;  %v387_v14 = vld [vmem:[%s556_s3 + $0x10] sm:$0xff]   ;;  %v388_v15 = vld [vmem:[%s556_s3 + $0x8] sm:$0xff]   ;;  %v389_v16 = vld [vmem:[%s556_s3] sm:$0xff]  }
   0x9   :  { %341 = vmatprep.subr.bf16.mxu0 %v424_v4  ;;  %375 = vmatprep.mubr.msk.bf16.mxu1 %vm425_vm1, %v424_v4  ;;  %v390_v17 = vld [vmem:[%s558_s5 + $0x38] sm:$0xff]   ;;  %v391_v18 = vld [vmem:[%s558_s5 + $0x30] sm:$0xff]   ;;  %v392_v19 = vld [vmem:[%s558_s5 + $0x28] sm:$0xff]  }
   0xa   :  { %360 = vmatpush3.bf16.msra.mxu1 %v390_v17  ;;  %v301_v24 = vld [vmem:[%s554_s1] ss:$0 sm:$0xff]  ;;  %v394_v31 = vld [vmem:[%s558_s5 + $0x18] sm:$0xff]   ;;  %v395_v32 = vld [vmem:[%s558_s5 + $0x10] sm:$0xff]  }
   0xb   :  { %361 = vmatprep.subr.bf16.mxu1 %v424_v4  ;;  %v302_v26 = vld [vmem:[%s555_s2] ss:$0 sm:$0xff]  ;;  %v396_v33 = vld [vmem:[%s558_s5 + $0x8] sm:$0xff]  }
   0xc   :  { %342 = vmatpush3.bf16.msra.mxu0 %v383_v5  ;;  %v393_v30 = vld [vmem:[%s558_s5 + $0x20] sm:$0xff]  }
   0xd   :  { %343 = vmatprep.subr.bf16.mxu0 %v424_v4  ;;  %v397_v34 = vld [vmem:[%s558_s5] sm:$0xff]   ;;  %s426_s5 = smov [#allocation2]  }
   0xe   :  { %362 = vmatpush3.bf16.msra.mxu1 %v391_v18  ;;  %v303_v35 = vld [vmem:[%s557_s4] ss:$0 sm:$0xff]  ;;  %s293_s15 = sshll.u32 %s426_s5, 4  ;;  %s294_s15 = int_to_ptr.vmem [resolvable:$true] %s293_s15 }
   0xf   :  { %363 = vmatprep.subr.bf16.mxu1 %v424_v4  ;;  %v312_v43 = vld [vmem:[%s559_s6] ss:$0 sm:$0xff]  ;;  %s402_s4 = scalar_lea.vmem %s294_s15, 32  ;;  %p407_p1 = scmp.lt.s32.totalorder %s294_s15, %s294_s15 }
  0x10   :  { %344 = vmatpush3.bf16.msra.mxu0 %v384_v11  ;;  %p403_p0 = scmp.ne.s32.totalorder %s294_s15, %s402_s4  ;;  %p408_p2 = scmp.lt.s32.totalorder %s402_s4, %s402_s4 }
  0x11   :  { %345 = vmatprep.subr.bf16.mxu0 %v424_v4 }
  0x12   :  { %364 = vmatpush3.bf16.msra.mxu1 %v392_v19  ;;  %p409_p3 = por %p408_p2, %p407_p1 }
  0x13   :  { %365 = vmatprep.subr.bf16.mxu1 %v424_v4 }
  0x14   :  { %346 = vmatpush3.bf16.msra.mxu0 %v385_v12  ;;  %p410_p4 = pnand %p409_p3, %p403_p0 }
  0x15   :  { %347 = vmatprep.subr.bf16.mxu0 %v424_v4 }
  0x16   :  { %366 = vmatpush3.bf16.msra.mxu1 %v393_v30 }
  0x17   :  { %367 = vmatprep.subr.bf16.mxu1 %v424_v4 }
  0x18   :  { %348 = vmatpush3.bf16.msra.mxu0 %v386_v13 }
  0x19   :  { %349 = vmatprep.subr.bf16.mxu0 %v424_v4 }
  0x1a   :  { %368 = vmatpush3.bf16.msra.mxu1 %v394_v31 }
  0x1b   :  { %369 = vmatprep.subr.bf16.mxu1 %v424_v4 }
  0x1c   :  { %350 = vmatpush3.bf16.msra.mxu0 %v387_v14 }
  0x1d   :  { %351 = vmatprep.subr.bf16.mxu0 %v424_v4 }
  0x1e   :  { %370 = vmatpush3.bf16.msra.mxu1 %v395_v32 }
  0x1f   :  { %371 = vmatprep.subr.bf16.mxu1 %v424_v4 }
  0x20   :  { %352 = vmatpush3.bf16.msra.mxu0 %v388_v15 }
  0x21   :  { %353 = vmatprep.subr.bf16.mxu0 %v424_v4 }
  0x22   :  { %372 = vmatpush3.bf16.msra.mxu1 %v396_v33 }
  0x23   :  { %373 = vmatprep.subr.bf16.mxu1 %v424_v4 }
  0x24   :  { %354 = vmatpush3.bf16.msra.mxu0 %v389_v16 }
  0x26   :  { %374 = vmatpush3.bf16.msra.mxu1 %v397_v34 }
  0x8e   :  { %v33_v6 = vpop.xlane.xlu0 %32 }
  0x8f   :  { %v35_v7 = vmul.f32 0.0078125, %v33_v6 }
  0x91   :  { %v36_v8 = vsub.f32 %v29_v1, %v35_v7 }
  0x93   :  { %v37_v9 = vmul.f32 %v36_v8, %v36_v8 }
  0x95   :  { %v38_v10 = vsel %vm30_vm0, %v37_v9, 0.0 }
  0x96   :  { %39 = vadd.xlane.f32.xlu0 %v38_v10 }
 0x11f   :  { %v40_v20 = vpop.xlane.xlu0 %39 }
 0x120   :  { %v41_v21 = vmul.f32 0.0078125, %v40_v20 }
 0x122   :  { %v42_v22 = vadd.f32 1e-12, %v41_v21 }
 0x124   :  { %398 = vrsqrt.f32 %v42_v22 }
 0x131   :  { %v399_v23 = vpop.eup %398 }
 0x132   :  { %v44_v25 = vmul.f32 %v399_v23, %v36_v8 }
 0x134   :  { %v52_v27 = vmul.f32 %v301_v24, %v44_v25 }
 0x136   :  { %v60_v28 = vadd.f32 %v302_v26, %v52_v27 }
 0x138   :  { %v61_v29 = vpack.c.bf16 %v60_v28, %v60_v28 }
 0x13a   :  { %356 = vmatmul.mubr.bf16.vlgmr.msra.gmra.mxu0 %v61_v29 }
 0x1fa   :  { %v167_v36 = vpop.f32.mrf.mxu0 }
 0x1fb   :  { %v168_v37 = vadd.f32 %v303_v35, %v167_v36 }
 0x1fc   :  { %v357_v38 = vpop.f32.mrf.mxu0 }
 0x1fd   :  { %400 = vtanh.f32 %v168_v37 }
 0x1fe   :  { %v170_v39 = vpop.f32.mrf.mxu0 }
 0x200   :  { %v358_v40 = vpop.f32.mrf.mxu0 }
 0x20a   :  { %v401_v41 = vpop.eup %400 }
 0x20b   :  { %v174_v42 = vpack.c.bf16 %v401_v41, %v401_v41 }
 0x20d   :  { %376 = vmatmul.mubr.bf16.vlgmr.msra.gmra.mxu1 %v174_v42 }
 0x2cd   :  { %v280_v44 = vpop.f32.mrf.mxu1 }
 0x2ce   :  { %v281_v45 = vadd.f32 %v312_v43, %v280_v44 }
 0x2cf   :  { %v377_v46 = vpop.f32.mrf.mxu1 }
 0x2d0   :  { %286 = vst [vmem:[#allocation2] sm:$0x3] %v281_v45 }
 0x2d1   :  { %v283_v47 = vpop.f32.mrf.mxu1 }
 0x2d2   :  { %413 = shalt.err (!%p410_p4)
}
 0x2d3   :  { %296 = dma.vmem_to_hbm [thread:$0]  %s294_s15, 32, %s560_s7, [#allocation3]   ;;  %v378_v48 = vpop.f32.mrf.mxu1 }
 0x2d4   :  { %422 = dma.done.wait [#allocation3], 32  }
 0x2d5   :  { %423 = vsyncadd [#allocation3], 4294967264 }
 0x2d6   :  { %300 = vsyncpa [#allocation3], 1 }

</bundles_post_ra>
